<compile_context>
chip_gen: v6e
topology: v6e:2x2x1
jax: 0.10.0
libtpu: 0.0.40
codegen_flags: <defaults>
</compile_context>

<pallas_src>
import math

import jax
import jax.numpy as jnp
from jax.experimental import pallas as pl
from jax.experimental.pallas import tpu as pltpu

D_MODEL = 32
NUM_HEADS = 4
D_K = D_MODEL // NUM_HEADS
D_FF = 64
LN_EPS = 1e-5
NEG_INF = -1000000000.0


def decoder_layer_kernel(
    x_ref, enc_ref, smask_ref, emask_ref,
    wmat_ref,   # (160, 128): rows [0:32] w_self [WQ|WK|WV|WO], [32:64] w_cross,
                #             [64:96] f_w1 (lanes 0:64), [96:160] f_w2 (lanes 0:32)
    pvec_ref,   # (10, 128): rows = b_self, b_cross, b_f1(:64), b_f2(:32),
                #            g1, be1, g2, be2, g3, be3 (each :32)
    out_ref,
):
    Bt, S, D = x_ref.shape
    Se = enc_ref.shape[1]
    H, dk = NUM_HEADS, D_K

    x = x_ref[...].reshape(Bt * S, D)        # flattened rows for projections/FFN
    enc = enc_ref[...].reshape(Bt * Se, D)
    smask_bias = smask_ref[...]              # (S, S)      additive: 0 or NEG_INF
    emask_bias = emask_ref[...]              # (Bt, 1, Se) additive: 0 or NEG_INF

    # --- unpack the two weight slabs (row/sublane slices; lane trims once per step) ---
    w_self = wmat_ref[0:D, :]                        # (32, 128)
    w_cross = wmat_ref[D:2 * D, :]                   # (32, 128)
    f_w1 = wmat_ref[2 * D:3 * D, 0:D_FF]             # (32, 64)
    f_w2 = wmat_ref[3 * D:3 * D + D_FF, 0:D]         # (64, 32)
    b_self = pvec_ref[0:1, :]                        # (1, 128)
    b_cross = pvec_ref[1:2, :]                       # (1, 128)
    b_f1 = pvec_ref[2:3, 0:D_FF]                     # (1, 64)
    b_f2 = pvec_ref[3:4, 0:D]                        # (1, 32)
    g1, be1 = pvec_ref[4:5, 0:D], pvec_ref[5:6, 0:D]
    g2, be2 = pvec_ref[6:7, 0:D], pvec_ref[7:8, 0:D]
    g3, be3 = pvec_ref[8:9, 0:D], pvec_ref[9:10, 0:D]

    def layer_norm(v, g, b):
        mu = jnp.mean(v, axis=-1, keepdims=True)
        var = jnp.mean(jnp.square(v - mu), axis=-1, keepdims=True)
        return (v - mu) * jax.lax.rsqrt(var + LN_EPS) * g + b

    def softmax_last(s):
        m = jnp.max(s, axis=-1, keepdims=True)
        p = jnp.exp(s - m)
        # EUP approximate reciprocal: separate issue slot, accurate enough here.
        return p * pl.reciprocal(jnp.sum(p, axis=-1, keepdims=True), approx=True)

    scale = 1.0 / math.sqrt(dk)

    def attention(q_rows, k_rows, v_rows, Sq, Sk, mask_bias, wo, bo):
        # q/k/v rows already projected + biased: (Bt*Sq, D) / (Bt*Sk, D).
        q = q_rows.reshape(Bt, Sq, D)
        k = k_rows.reshape(Bt, Sk, D)
        v = v_rows.reshape(Bt, Sk, D)
        out2d = None
        for h in range(H):   # static unroll; only tiny (Sq,Sk) score/context matmuls
            lo, hi = h * dk, (h + 1) * dk
            sc = jax.lax.dot_general(
                q[:, :, lo:hi], k[:, :, lo:hi],
                (((2,), (2,)), ((0,), (0,))),
                preferred_element_type=jnp.float32) * scale          # (Bt, Sq, Sk)
            attn = softmax_last(sc + mask_bias)
            ctx_h = jax.lax.dot_general(
                attn, v[:, :, lo:hi],
                (((2,), (1,)), ((0,), (0,))),
                preferred_element_type=jnp.float32)                  # (Bt, Sq, dk)
            # Fold the output projection in per head (sublane slice of WO) — no
            # lane-axis concat of heads needed.
            part = jnp.dot(ctx_h.reshape(Bt * Sq, dk), wo[lo:hi, :],
                           preferred_element_type=jnp.float32)       # (Bt*Sq, D)
            out2d = part if out2d is None else out2d + part
        return out2d + bo

    # --- block 1: pre-norm self-attention + residual ---
    x_n1 = layer_norm(x, g1, be1)
    qkv = (jnp.dot(x_n1, w_self[:, 0:3 * D], preferred_element_type=jnp.float32)
           + b_self[:, 0:3 * D])
    sa = attention(qkv[:, 0:D], qkv[:, D:2 * D], qkv[:, 2 * D:3 * D],
                   S, S, smask_bias,
                   w_self[:, 3 * D:4 * D], b_self[:, 3 * D:4 * D])
    # TODO(synk): dropout layers are identity here (inference semantics).
    x2 = x + sa

    # --- block 2: pre-norm encoder-decoder attention + residual ---
    x_n2 = layer_norm(x2, g2, be2)
    q_c = (jnp.dot(x_n2, w_cross[:, 0:D], preferred_element_type=jnp.float32)
           + b_cross[:, 0:D])
    kv_c = (jnp.dot(enc, w_cross[:, D:3 * D], preferred_element_type=jnp.float32)
            + b_cross[:, D:3 * D])
    ca = attention(q_c, kv_c[:, 0:D], kv_c[:, D:2 * D],
                   S, Se, emask_bias,
                   w_cross[:, 3 * D:4 * D], b_cross[:, 3 * D:4 * D])
    x3 = x2 + ca

    # --- block 3: FFN; the residual is the cross-attn output (matches the PyTorch code) ---
    x_n3 = layer_norm(x3, g3, be3)
    hidden = jnp.maximum(
        jnp.dot(x_n3, f_w1, preferred_element_type=jnp.float32) + b_f1, 0.0)
    ffn = jnp.dot(hidden, f_w2, preferred_element_type=jnp.float32) + b_f2
    # TODO(synk): PoswiseFeedwardNet's ratio_neg side-output is unused by DecoderLayer; omitted.
    out_ref[...] = (ca + ffn).reshape(Bt, S, D).astype(out_ref.dtype)


def _tensorcores_per_chip():
    """Best-effort detection of chips whose TensorCores a 'parallel' grid axis can use."""
    try:
        kind = jax.devices()[0].device_kind.lower()
    except Exception:
        return 1
    if any(tag in kind for tag in ("v7", "7x", "v4", "v5p", "v5 p")):
        return 2
    return 1


def _pick_block_b(B, block_b):
    if block_b is None:
        n_cores = _tensorcores_per_chip()
        if n_cores <= 1:
            block_b = B                    # v5e/v6e: whole batch, one grid step
        else:
            block_b = max(1, B // n_cores)  # v7x/megacore: >=2 parallel grid steps
    bt = max(1, min(B, block_b))
    while B % bt:
        bt -= 1
    return bt


def decoder_layer(x, self_mask, enc_output, enc_pad_mask, params, block_b=None):
    """x: (B,S,D); self_mask: (S,S) shared causal mask (1.0 => masked);
       enc_output: (B,Se,D); enc_pad_mask: (B,1,Se) (1.0 => masked)."""
    B, S, D = x.shape
    Se = enc_output.shape[1]
    assert D == D_MODEL

    p = params
    f32 = jnp.float32
    W = 4 * D_MODEL   # 128-lane slab width

    # --- pack all weights into two lane-dense (rows, 128) slabs -------------
    w_self = jnp.concatenate([p['sa_wq'], p['sa_wk'], p['sa_wv'], p['sa_wo']], axis=1)
    w_cross = jnp.concatenate([p['ca_wq'], p['ca_wk'], p['ca_wv'], p['ca_wo']], axis=1)
    f_w1 = jnp.pad(p['f_w1'], ((0, 0), (0, W - D_FF)))     # (32, 64) -> (32, 128)
    f_w2 = jnp.pad(p['f_w2'], ((0, 0), (0, W - D_MODEL)))  # (64, 32) -> (64, 128)
    wmat = jnp.concatenate([w_self, w_cross, f_w1, f_w2], axis=0).astype(f32)  # (160, 128)

    def row(v):
        v = jnp.asarray(v, f32).reshape(1, -1)
        return jnp.pad(v, ((0, 0), (0, W - v.shape[1])))

    pvec = jnp.concatenate([
        row(jnp.concatenate([p['sa_bq'], p['sa_bk'], p['sa_bv'], p['sa_bo']])),
        row(jnp.concatenate([p['ca_bq'], p['ca_bk'], p['ca_bv'], p['ca_bo']])),
        row(p['f_b1']), row(p['f_b2']),
        row(p['g1']), row(p['be1']),
        row(p['g2']), row(p['be2']),
        row(p['g3']), row(p['be3']),
    ], axis=0)                                              # (10, 128)

    # Compact additive mask biases (no batch/seq broadcast materialized in HBM).
    smask_bias = (self_mask != 0).astype(f32) * NEG_INF                       # (S, S)
    emask_bias = (enc_pad_mask.reshape(B, 1, Se) != 0).astype(f32) * NEG_INF  # (B, 1, Se)

    bt = _pick_block_b(B, block_b)
    grid = (B // bt,)

    in_specs = [
        pl.BlockSpec((bt, S, D), lambda b: (b, 0, 0)),      # x
        pl.BlockSpec((bt, Se, D), lambda b: (b, 0, 0)),     # enc_output
        pl.BlockSpec((S, S), lambda b: (0, 0)),             # shared causal mask bias
        pl.BlockSpec((bt, 1, Se), lambda b: (b, 0, 0)),     # pad mask bias
        pl.BlockSpec(wmat.shape, lambda b: (0, 0)),         # packed matmul weights
        pl.BlockSpec(pvec.shape, lambda b: (0, 0)),         # packed biases / LN params
    ]
    out_specs = pl.BlockSpec((bt, S, D), lambda b: (b, 0, 0))

    return pl.pallas_call(
        decoder_layer_kernel,
        out_shape=jax.ShapeDtypeStruct((B, S, D), jnp.float32),
        grid_spec=pltpu.PrefetchScalarGridSpec(
            num_scalar_prefetch=0,
            grid=grid,
            in_specs=in_specs,
            out_specs=out_specs,
        ),
        compiler_params=pltpu.CompilerParams(
            dimension_semantics=("parallel",)),
    )(x, enc_output, smask_bias, emask_bias, wmat, pvec)


def init_params(key):
    ks = jax.random.split(key, 32)
    it = iter(ks)

    def w(shape, scale=0.1):
        return jax.random.normal(next(it), shape, jnp.float32) * scale

    D, dff = D_MODEL, D_FF
    params = {}
    for prefix in ('sa', 'ca'):
        params[f'{prefix}_wq'] = w((D, D)); params[f'{prefix}_bq'] = w((D,), 0.02)
        params[f'{prefix}_wk'] = w((D, D)); params[f'{prefix}_bk'] = w((D,), 0.02)
        params[f'{prefix}_wv'] = w((D, D)); params[f'{prefix}_bv'] = w((D,), 0.02)
        params[f'{prefix}_wo'] = w((D, D)); params[f'{prefix}_bo'] = w((D,), 0.02)
    params['f_w1'] = w((D, dff)); params['f_b1'] = w((dff,), 0.02)
    params['f_w2'] = w((dff, D)); params['f_b2'] = w((D,), 0.02)
    # nn.LayerNorm default init: weight=1, bias=0
    for i in (1, 2, 3):
        params[f'g{i}'] = jnp.ones((D,), jnp.float32)
        params[f'be{i}'] = jnp.zeros((D,), jnp.float32)
    return params


def reference_decoder_layer(x, self_mask, enc, enc_pad_mask, p):
    """Pure-JAX reference replicating the PyTorch forward (eval mode)."""
    H, dk = NUM_HEADS, D_K
    B, S, D = x.shape
    Se = enc.shape[1]

    def ln(v, g, b):
        mu = v.mean(-1, keepdims=True)
        var = ((v - mu) ** 2).mean(-1, keepdims=True)
        return (v - mu) * jax.lax.rsqrt(var + LN_EPS) * g + b

    def mha(xq, xkv, mask, wq, bq, wk, bk, wv, bv, wo, bo):
        Sq, Sk = xq.shape[1], xkv.shape[1]
        Q = (xq @ wq + bq).reshape(B, Sq, H, dk).transpose(0, 2, 1, 3)
        K = (xkv @ wk + bk).reshape(B, Sk, H, dk).transpose(0, 2, 1, 3)
        V = (xkv @ wv + bv).reshape(B, Sk, H, dk).transpose(0, 2, 1, 3)
        scores = jnp.einsum('bhqd,bhkd->bhqk', Q, K) / math.sqrt(dk)
        scores = jnp.where(mask[:, None].astype(bool), NEG_INF, scores)
        attn = jax.nn.softmax(scores, axis=-1)
        ctx = jnp.einsum('bhqk,bhkd->bhqd', attn, V)
        ctx = ctx.transpose(0, 2, 1, 3).reshape(B, Sq, H * dk)
        return ctx @ wo + bo

    smask = jnp.broadcast_to(self_mask, (B, S, S))
    emask = jnp.broadcast_to(enc_pad_mask.reshape(B, 1, Se), (B, S, Se))

    x_n1 = ln(x, p['g1'], p['be1'])
    sa = mha(x_n1, x_n1, smask, p['sa_wq'], p['sa_bq'], p['sa_wk'], p['sa_bk'],
             p['sa_wv'], p['sa_bv'], p['sa_wo'], p['sa_bo'])
    x2 = x + sa
    x_n2 = ln(x2, p['g2'], p['be2'])
    ca = mha(x_n2, enc, emask, p['ca_wq'], p['ca_bq'], p['ca_wk'], p['ca_bk'],
             p['ca_wv'], p['ca_bv'], p['ca_wo'], p['ca_bo'])
    x3 = x2 + ca
    x_n3 = ln(x3, p['g3'], p['be3'])
    hidden = jnp.maximum(x_n3 @ p['f_w1'] + p['f_b1'], 0.0)
    ffn = hidden @ p['f_w2'] + p['f_b2']
    return ca + ffn  # residual is the cross-attn output, as in the PyTorch module


if __name__ == "__main__":
    key = jax.random.PRNGKey(0)
    k_x, k_enc, k_p = jax.random.split(key, 3)

    B, S, Se = 2, 8, 16
    x = jax.random.normal(k_x, (B, S, D_MODEL), jnp.float32)
    enc = jax.random.normal(k_enc, (B, Se, D_MODEL), jnp.float32)

    # causal self-attention mask, shared across batch (1.0 == masked)
    self_mask = jnp.triu(jnp.ones((S, S), jnp.float32), k=1)
    # encoder pad mask: last 4 encoder positions of batch element 1 are padding
    enc_pad_mask = jnp.zeros((B, 1, Se), jnp.float32).at[1, 0, Se - 4:].set(1.0)

    params = init_params(k_p)

    out = decoder_layer(x, self_mask, enc, enc_pad_mask, params)
    out = jax.block_until_ready(out)

    ref = reference_decoder_layer(x, self_mask, enc, enc_pad_mask, params)
    assert out.shape == (B, S, D_MODEL)
    max_err = jnp.max(jnp.abs(out - ref))
    assert jnp.allclose(out, ref, atol=2e-3, rtol=2e-3), f"max abs err {max_err}"
    print("KERNEL_OK")
</pallas_src>

<mosaic_0001>
module attributes {stable_mosaic.version = 11 : i64} {
  func.func @decoder_layer_kernel(%arg0: i32, %arg1: memref<2x8x32xf32, #tpu.memory_space<vmem>>, %arg2: memref<2x16x32xf32, #tpu.memory_space<vmem>>, %arg3: memref<8x8xf32, #tpu.memory_space<vmem>>, %arg4: memref<2x1x16xf32, #tpu.memory_space<vmem>>, %arg5: memref<160x128xf32, #tpu.memory_space<vmem>>, %arg6: memref<10x128xf32, #tpu.memory_space<vmem>>, %arg7: memref<2x8x32xf32, #tpu.memory_space<vmem>>) attributes {dimension_semantics = [#tpu.dimension_semantics<parallel>], iteration_bounds = array<i64: 1>, scalar_prefetch = 0 : i64, scratch_operands = 0 : i64, tpu.core_type = #tpu.core_type<tc>, window_params = [{transform_indices = @transform_0, window_bounds = array<i64: 2, 8, 32>}, {transform_indices = @transform_1, window_bounds = array<i64: 2, 16, 32>}, {pipeline_mode = #tpu.pipeline_mode<synchronous>, transform_indices = @transform_2, window_bounds = array<i64: 8, 8>}, {transform_indices = @transform_3, window_bounds = array<i64: 2, 1, 16>}, {pipeline_mode = #tpu.pipeline_mode<synchronous>, transform_indices = @transform_4, window_bounds = array<i64: 160, 128>}, {pipeline_mode = #tpu.pipeline_mode<synchronous>, transform_indices = @transform_5, window_bounds = array<i64: 10, 128>}, {transform_indices = @transform_6, window_bounds = array<i64: 2, 8, 32>}]} {
    %c0 = arith.constant 0 : index
    %c0_0 = arith.constant 0 : index
    %c0_1 = arith.constant 0 : index
    %0 = vector.load %arg1[%c0, %c0_0, %c0_1] : memref<2x8x32xf32, #tpu.memory_space<vmem>>, vector<2x8x32xf32>
    %1 = vector.shape_cast %0 : vector<2x8x32xf32> to vector<16x32xf32>
    %c0_2 = arith.constant 0 : index
    %c0_3 = arith.constant 0 : index
    %c0_4 = arith.constant 0 : index
    %2 = vector.load %arg2[%c0_2, %c0_3, %c0_4] : memref<2x16x32xf32, #tpu.memory_space<vmem>>, vector<2x16x32xf32>
    %3 = vector.shape_cast %2 : vector<2x16x32xf32> to vector<32x32xf32>
    %c0_5 = arith.constant 0 : index
    %c0_6 = arith.constant 0 : index
    %4 = vector.load %arg3[%c0_5, %c0_6] : memref<8x8xf32, #tpu.memory_space<vmem>>, vector<8x8xf32>
    %c0_7 = arith.constant 0 : index
    %c0_8 = arith.constant 0 : index
    %c0_9 = arith.constant 0 : index
    %5 = vector.load %arg4[%c0_7, %c0_8, %c0_9] : memref<2x1x16xf32, #tpu.memory_space<vmem>>, vector<2x1x16xf32>
    %c0_10 = arith.constant 0 : index
    %c0_11 = arith.constant 0 : index
    %6 = vector.load %arg5[%c0_10, %c0_11] : memref<160x128xf32, #tpu.memory_space<vmem>>, vector<32x128xf32>
    %c32 = arith.constant 32 : index
    %c0_12 = arith.constant 0 : index
    %7 = vector.load %arg5[%c32, %c0_12] : memref<160x128xf32, #tpu.memory_space<vmem>>, vector<32x128xf32>
    %c64 = arith.constant 64 : index
    %c0_13 = arith.constant 0 : index
    %8 = vector.load %arg5[%c64, %c0_13] : memref<160x128xf32, #tpu.memory_space<vmem>>, vector<32x64xf32>
    %c96 = arith.constant 96 : index
    %c0_14 = arith.constant 0 : index
    %9 = vector.load %arg5[%c96, %c0_14] : memref<160x128xf32, #tpu.memory_space<vmem>>, vector<64x32xf32>
    %c0_15 = arith.constant 0 : index
    %c0_16 = arith.constant 0 : index
    %10 = vector.load %arg6[%c0_15, %c0_16] : memref<10x128xf32, #tpu.memory_space<vmem>>, vector<1x128xf32>
    %c1 = arith.constant 1 : index
    %c0_17 = arith.constant 0 : index
    %11 = vector.load %arg6[%c1, %c0_17] : memref<10x128xf32, #tpu.memory_space<vmem>>, vector<1x128xf32>
    %c2 = arith.constant 2 : index
    %c0_18 = arith.constant 0 : index
    %12 = vector.load %arg6[%c2, %c0_18] : memref<10x128xf32, #tpu.memory_space<vmem>>, vector<1x64xf32>
    %c3 = arith.constant 3 : index
    %c0_19 = arith.constant 0 : index
    %13 = vector.load %arg6[%c3, %c0_19] : memref<10x128xf32, #tpu.memory_space<vmem>>, vector<1x32xf32>
    %c4 = arith.constant 4 : index
    %c0_20 = arith.constant 0 : index
    %14 = vector.load %arg6[%c4, %c0_20] : memref<10x128xf32, #tpu.memory_space<vmem>>, vector<1x32xf32>
    %c5 = arith.constant 5 : index
    %c0_21 = arith.constant 0 : index
    %15 = vector.load %arg6[%c5, %c0_21] : memref<10x128xf32, #tpu.memory_space<vmem>>, vector<1x32xf32>
    %c6 = arith.constant 6 : index
    %c0_22 = arith.constant 0 : index
    %16 = vector.load %arg6[%c6, %c0_22] : memref<10x128xf32, #tpu.memory_space<vmem>>, vector<1x32xf32>
    %c7 = arith.constant 7 : index
    %c0_23 = arith.constant 0 : index
    %17 = vector.load %arg6[%c7, %c0_23] : memref<10x128xf32, #tpu.memory_space<vmem>>, vector<1x32xf32>
    %c8 = arith.constant 8 : index
    %c0_24 = arith.constant 0 : index
    %18 = vector.load %arg6[%c8, %c0_24] : memref<10x128xf32, #tpu.memory_space<vmem>>, vector<1x32xf32>
    %c9 = arith.constant 9 : index
    %c0_25 = arith.constant 0 : index
    %19 = vector.load %arg6[%c9, %c0_25] : memref<10x128xf32, #tpu.memory_space<vmem>>, vector<1x32xf32>
    %cst = arith.constant dense<0.000000e+00> : vector<16xf32>
    %20 = vector.multi_reduction <add>, %1, %cst [1] : vector<16x32xf32> to vector<16xf32>
    %21 = vector.shape_cast %20 : vector<16xf32> to vector<16x1xf32>
    %cst_26 = arith.constant 3.200000e+01 : f32
    %22 = vector.broadcast %cst_26 : f32 to vector<16x1xf32>
    %23 = arith.divf %21, %22 : vector<16x1xf32>
    %24 = vector.broadcast %23 : vector<16x1xf32> to vector<16x32xf32>
    %25 = arith.subf %1, %24 : vector<16x32xf32>
    %26 = arith.mulf %25, %25 : vector<16x32xf32>
    %cst_27 = arith.constant dense<0.000000e+00> : vector<16xf32>
    %27 = vector.multi_reduction <add>, %26, %cst_27 [1] : vector<16x32xf32> to vector<16xf32>
    %28 = vector.shape_cast %27 : vector<16xf32> to vector<16x1xf32>
    %cst_28 = arith.constant 3.200000e+01 : f32
    %29 = vector.broadcast %cst_28 : f32 to vector<16x1xf32>
    %30 = arith.divf %28, %29 : vector<16x1xf32>
    %31 = vector.broadcast %23 : vector<16x1xf32> to vector<16x32xf32>
    %32 = arith.subf %1, %31 : vector<16x32xf32>
    %cst_29 = arith.constant 9.99999974E-6 : f32
    %33 = vector.broadcast %cst_29 : f32 to vector<16x1xf32>
    %34 = arith.addf %30, %33 : vector<16x1xf32>
    %35 = math.rsqrt %34 : vector<16x1xf32>
    %36 = vector.broadcast %35 : vector<16x1xf32> to vector<16x32xf32>
    %37 = arith.mulf %32, %36 : vector<16x32xf32>
    %38 = vector.broadcast %14 : vector<1x32xf32> to vector<16x32xf32>
    %39 = arith.mulf %37, %38 : vector<16x32xf32>
    %40 = vector.broadcast %15 : vector<1x32xf32> to vector<16x32xf32>
    %41 = arith.addf %39, %40 : vector<16x32xf32>
    %42 = vector.extract_strided_slice %6 {offsets = [0, 0], sizes = [32, 96], strides = [1, 1]} : vector<32x128xf32> to vector<32x96xf32>
    %cst_30 = arith.constant dense<0.000000e+00> : vector<16x96xf32>
    %43 = tpu.matmul %41, %42, %cst_30 {dimension_numbers = #tpu.dot_dimension_numbers<[1], [0], [0], [1], [0, 0, 1, 1], [], []>} : vector<16x32xf32>, vector<32x96xf32>, vector<16x96xf32> -> vector<16x96xf32>
    %44 = vector.extract_strided_slice %10 {offsets = [0, 0], sizes = [1, 96], strides = [1, 1]} : vector<1x128xf32> to vector<1x96xf32>
    %45 = vector.broadcast %44 : vector<1x96xf32> to vector<16x96xf32>
    %46 = arith.addf %43, %45 : vector<16x96xf32>
    %47 = vector.extract_strided_slice %46 {offsets = [0, 0], sizes = [16, 32], strides = [1, 1]} : vector<16x96xf32> to vector<16x32xf32>
    %48 = vector.extract_strided_slice %46 {offsets = [0, 32], sizes = [16, 32], strides = [1, 1]} : vector<16x96xf32> to vector<16x32xf32>
    %49 = vector.extract_strided_slice %46 {offsets = [0, 64], sizes = [16, 32], strides = [1, 1]} : vector<16x96xf32> to vector<16x32xf32>
    %50 = vector.extract_strided_slice %6 {offsets = [0, 96], sizes = [32, 32], strides = [1, 1]} : vector<32x128xf32> to vector<32x32xf32>
    %51 = vector.extract_strided_slice %10 {offsets = [0, 96], sizes = [1, 32], strides = [1, 1]} : vector<1x128xf32> to vector<1x32xf32>
    %52 = vector.shape_cast %47 : vector<16x32xf32> to vector<2x8x32xf32>
    %53 = vector.shape_cast %48 : vector<16x32xf32> to vector<2x8x32xf32>
    %54 = vector.shape_cast %49 : vector<16x32xf32> to vector<2x8x32xf32>
    %55 = vector.extract_strided_slice %52 {offsets = [0, 0, 0], sizes = [2, 8, 8], strides = [1, 1, 1]} : vector<2x8x32xf32> to vector<2x8x8xf32>
    %56 = vector.extract_strided_slice %53 {offsets = [0, 0, 0], sizes = [2, 8, 8], strides = [1, 1, 1]} : vector<2x8x32xf32> to vector<2x8x8xf32>
    %cst_31 = arith.constant dense<0.000000e+00> : vector<2x8x8xf32>
    %57 = tpu.matmul %55, %56, %cst_31 {dimension_numbers = #tpu.dot_dimension_numbers<[2], [2], [1], [1], [0, 0, 0, 1, 1, 1], [0], [0]>} : vector<2x8x8xf32>, vector<2x8x8xf32>, vector<2x8x8xf32> -> vector<2x8x8xf32>
    %cst_32 = arith.constant 0.353553385 : f32
    %58 = vector.broadcast %cst_32 : f32 to vector<2x8x8xf32>
    %59 = arith.mulf %57, %58 : vector<2x8x8xf32>
    %60 = vector.shape_cast %4 : vector<8x8xf32> to vector<1x8x8xf32>
    %61 = vector.broadcast %60 : vector<1x8x8xf32> to vector<2x8x8xf32>
    %62 = arith.addf %59, %61 : vector<2x8x8xf32>
    %cst_33 = arith.constant dense<0xFF800000> : vector<2x8xf32>
    %63 = vector.multi_reduction <maximumf>, %62, %cst_33 [2] : vector<2x8x8xf32> to vector<2x8xf32>
    %64 = vector.shape_cast %63 : vector<2x8xf32> to vector<2x8x1xf32>
    %65 = vector.broadcast %64 : vector<2x8x1xf32> to vector<2x8x8xf32>
    %66 = arith.subf %62, %65 : vector<2x8x8xf32>
    %67 = math.exp %66 : vector<2x8x8xf32>
    %cst_34 = arith.constant dense<0.000000e+00> : vector<2x8xf32>
    %68 = vector.multi_reduction <add>, %67, %cst_34 [2] : vector<2x8x8xf32> to vector<2x8xf32>
    %69 = vector.shape_cast %68 : vector<2x8xf32> to vector<2x8x1xf32>
    %70 = tpu.reciprocal %69 {approx = true} : vector<2x8x1xf32> -> vector<2x8x1xf32>
    %71 = vector.broadcast %70 : vector<2x8x1xf32> to vector<2x8x8xf32>
    %72 = arith.mulf %67, %71 : vector<2x8x8xf32>
    %73 = vector.extract_strided_slice %54 {offsets = [0, 0, 0], sizes = [2, 8, 8], strides = [1, 1, 1]} : vector<2x8x32xf32> to vector<2x8x8xf32>
    %cst_35 = arith.constant dense<0.000000e+00> : vector<2x8x8xf32>
    %74 = tpu.matmul %72, %73, %cst_35 {dimension_numbers = #tpu.dot_dimension_numbers<[2], [1], [1], [2], [0, 0, 0, 1, 1, 2], [0], [0]>} : vector<2x8x8xf32>, vector<2x8x8xf32>, vector<2x8x8xf32> -> vector<2x8x8xf32>
    %75 = vector.shape_cast %74 : vector<2x8x8xf32> to vector<16x8xf32>
    %76 = vector.extract_strided_slice %50 {offsets = [0, 0], sizes = [8, 32], strides = [1, 1]} : vector<32x32xf32> to vector<8x32xf32>
    %cst_36 = arith.constant dense<0.000000e+00> : vector<16x32xf32>
    %77 = tpu.matmul %75, %76, %cst_36 {dimension_numbers = #tpu.dot_dimension_numbers<[1], [0], [0], [1], [0, 0, 1, 1], [], []>} : vector<16x8xf32>, vector<8x32xf32>, vector<16x32xf32> -> vector<16x32xf32>
    %78 = vector.extract_strided_slice %52 {offsets = [0, 0, 8], sizes = [2, 8, 8], strides = [1, 1, 1]} : vector<2x8x32xf32> to vector<2x8x8xf32>
    %79 = vector.extract_strided_slice %53 {offsets = [0, 0, 8], sizes = [2, 8, 8], strides = [1, 1, 1]} : vector<2x8x32xf32> to vector<2x8x8xf32>
    %cst_37 = arith.constant dense<0.000000e+00> : vector<2x8x8xf32>
    %80 = tpu.matmul %78, %79, %cst_37 {dimension_numbers = #tpu.dot_dimension_numbers<[2], [2], [1], [1], [0, 0, 0, 1, 1, 1], [0], [0]>} : vector<2x8x8xf32>, vector<2x8x8xf32>, vector<2x8x8xf32> -> vector<2x8x8xf32>
    %cst_38 = arith.constant 0.353553385 : f32
    %81 = vector.broadcast %cst_38 : f32 to vector<2x8x8xf32>
    %82 = arith.mulf %80, %81 : vector<2x8x8xf32>
    %83 = vector.shape_cast %4 : vector<8x8xf32> to vector<1x8x8xf32>
    %84 = vector.broadcast %83 : vector<1x8x8xf32> to vector<2x8x8xf32>
    %85 = arith.addf %82, %84 : vector<2x8x8xf32>
    %cst_39 = arith.constant dense<0xFF800000> : vector<2x8xf32>
    %86 = vector.multi_reduction <maximumf>, %85, %cst_39 [2] : vector<2x8x8xf32> to vector<2x8xf32>
    %87 = vector.shape_cast %86 : vector<2x8xf32> to vector<2x8x1xf32>
    %88 = vector.broadcast %87 : vector<2x8x1xf32> to vector<2x8x8xf32>
    %89 = arith.subf %85, %88 : vector<2x8x8xf32>
    %90 = math.exp %89 : vector<2x8x8xf32>
    %cst_40 = arith.constant dense<0.000000e+00> : vector<2x8xf32>
    %91 = vector.multi_reduction <add>, %90, %cst_40 [2] : vector<2x8x8xf32> to vector<2x8xf32>
    %92 = vector.shape_cast %91 : vector<2x8xf32> to vector<2x8x1xf32>
    %93 = tpu.reciprocal %92 {approx = true} : vector<2x8x1xf32> -> vector<2x8x1xf32>
    %94 = vector.broadcast %93 : vector<2x8x1xf32> to vector<2x8x8xf32>
    %95 = arith.mulf %90, %94 : vector<2x8x8xf32>
    %96 = vector.extract_strided_slice %54 {offsets = [0, 0, 8], sizes = [2, 8, 8], strides = [1, 1, 1]} : vector<2x8x32xf32> to vector<2x8x8xf32>
    %cst_41 = arith.constant dense<0.000000e+00> : vector<2x8x8xf32>
    %97 = tpu.matmul %95, %96, %cst_41 {dimension_numbers = #tpu.dot_dimension_numbers<[2], [1], [1], [2], [0, 0, 0, 1, 1, 2], [0], [0]>} : vector<2x8x8xf32>, vector<2x8x8xf32>, vector<2x8x8xf32> -> vector<2x8x8xf32>
    %98 = vector.shape_cast %97 : vector<2x8x8xf32> to vector<16x8xf32>
    %99 = vector.extract_strided_slice %50 {offsets = [8, 0], sizes = [8, 32], strides = [1, 1]} : vector<32x32xf32> to vector<8x32xf32>
    %cst_42 = arith.constant dense<0.000000e+00> : vector<16x32xf32>
    %100 = tpu.matmul %98, %99, %cst_42 {dimension_numbers = #tpu.dot_dimension_numbers<[1], [0], [0], [1], [0, 0, 1, 1], [], []>} : vector<16x8xf32>, vector<8x32xf32>, vector<16x32xf32> -> vector<16x32xf32>
    %101 = arith.addf %77, %100 : vector<16x32xf32>
    %102 = vector.extract_strided_slice %52 {offsets = [0, 0, 16], sizes = [2, 8, 8], strides = [1, 1, 1]} : vector<2x8x32xf32> to vector<2x8x8xf32>
    %103 = vector.extract_strided_slice %53 {offsets = [0, 0, 16], sizes = [2, 8, 8], strides = [1, 1, 1]} : vector<2x8x32xf32> to vector<2x8x8xf32>
    %cst_43 = arith.constant dense<0.000000e+00> : vector<2x8x8xf32>
    %104 = tpu.matmul %102, %103, %cst_43 {dimension_numbers = #tpu.dot_dimension_numbers<[2], [2], [1], [1], [0, 0, 0, 1, 1, 1], [0], [0]>} : vector<2x8x8xf32>, vector<2x8x8xf32>, vector<2x8x8xf32> -> vector<2x8x8xf32>
    %cst_44 = arith.constant 0.353553385 : f32
    %105 = vector.broadcast %cst_44 : f32 to vector<2x8x8xf32>
    %106 = arith.mulf %104, %105 : vector<2x8x8xf32>
    %107 = vector.shape_cast %4 : vector<8x8xf32> to vector<1x8x8xf32>
    %108 = vector.broadcast %107 : vector<1x8x8xf32> to vector<2x8x8xf32>
    %109 = arith.addf %106, %108 : vector<2x8x8xf32>
    %cst_45 = arith.constant dense<0xFF800000> : vector<2x8xf32>
    %110 = vector.multi_reduction <maximumf>, %109, %cst_45 [2] : vector<2x8x8xf32> to vector<2x8xf32>
    %111 = vector.shape_cast %110 : vector<2x8xf32> to vector<2x8x1xf32>
    %112 = vector.broadcast %111 : vector<2x8x1xf32> to vector<2x8x8xf32>
    %113 = arith.subf %109, %112 : vector<2x8x8xf32>
    %114 = math.exp %113 : vector<2x8x8xf32>
    %cst_46 = arith.constant dense<0.000000e+00> : vector<2x8xf32>
    %115 = vector.multi_reduction <add>, %114, %cst_46 [2] : vector<2x8x8xf32> to vector<2x8xf32>
    %116 = vector.shape_cast %115 : vector<2x8xf32> to vector<2x8x1xf32>
    %117 = tpu.reciprocal %116 {approx = true} : vector<2x8x1xf32> -> vector<2x8x1xf32>
    %118 = vector.broadcast %117 : vector<2x8x1xf32> to vector<2x8x8xf32>
    %119 = arith.mulf %114, %118 : vector<2x8x8xf32>
    %120 = vector.extract_strided_slice %54 {offsets = [0, 0, 16], sizes = [2, 8, 8], strides = [1, 1, 1]} : vector<2x8x32xf32> to vector<2x8x8xf32>
    %cst_47 = arith.constant dense<0.000000e+00> : vector<2x8x8xf32>
    %121 = tpu.matmul %119, %120, %cst_47 {dimension_numbers = #tpu.dot_dimension_numbers<[2], [1], [1], [2], [0, 0, 0, 1, 1, 2], [0], [0]>} : vector<2x8x8xf32>, vector<2x8x8xf32>, vector<2x8x8xf32> -> vector<2x8x8xf32>
    %122 = vector.shape_cast %121 : vector<2x8x8xf32> to vector<16x8xf32>
    %123 = vector.extract_strided_slice %50 {offsets = [16, 0], sizes = [8, 32], strides = [1, 1]} : vector<32x32xf32> to vector<8x32xf32>
    %cst_48 = arith.constant dense<0.000000e+00> : vector<16x32xf32>
    %124 = tpu.matmul %122, %123, %cst_48 {dimension_numbers = #tpu.dot_dimension_numbers<[1], [0], [0], [1], [0, 0, 1, 1], [], []>} : vector<16x8xf32>, vector<8x32xf32>, vector<16x32xf32> -> vector<16x32xf32>
    %125 = arith.addf %101, %124 : vector<16x32xf32>
    %126 = vector.extract_strided_slice %52 {offsets = [0, 0, 24], sizes = [2, 8, 8], strides = [1, 1, 1]} : vector<2x8x32xf32> to vector<2x8x8xf32>
    %127 = vector.extract_strided_slice %53 {offsets = [0, 0, 24], sizes = [2, 8, 8], strides = [1, 1, 1]} : vector<2x8x32xf32> to vector<2x8x8xf32>
    %cst_49 = arith.constant dense<0.000000e+00> : vector<2x8x8xf32>
    %128 = tpu.matmul %126, %127, %cst_49 {dimension_numbers = #tpu.dot_dimension_numbers<[2], [2], [1], [1], [0, 0, 0, 1, 1, 1], [0], [0]>} : vector<2x8x8xf32>, vector<2x8x8xf32>, vector<2x8x8xf32> -> vector<2x8x8xf32>
    %cst_50 = arith.constant 0.353553385 : f32
    %129 = vector.broadcast %cst_50 : f32 to vector<2x8x8xf32>
    %130 = arith.mulf %128, %129 : vector<2x8x8xf32>
    %131 = vector.shape_cast %4 : vector<8x8xf32> to vector<1x8x8xf32>
    %132 = vector.broadcast %131 : vector<1x8x8xf32> to vector<2x8x8xf32>
    %133 = arith.addf %130, %132 : vector<2x8x8xf32>
    %cst_51 = arith.constant dense<0xFF800000> : vector<2x8xf32>
    %134 = vector.multi_reduction <maximumf>, %133, %cst_51 [2] : vector<2x8x8xf32> to vector<2x8xf32>
    %135 = vector.shape_cast %134 : vector<2x8xf32> to vector<2x8x1xf32>
    %136 = vector.broadcast %135 : vector<2x8x1xf32> to vector<2x8x8xf32>
    %137 = arith.subf %133, %136 : vector<2x8x8xf32>
    %138 = math.exp %137 : vector<2x8x8xf32>
    %cst_52 = arith.constant dense<0.000000e+00> : vector<2x8xf32>
    %139 = vector.multi_reduction <add>, %138, %cst_52 [2] : vector<2x8x8xf32> to vector<2x8xf32>
    %140 = vector.shape_cast %139 : vector<2x8xf32> to vector<2x8x1xf32>
    %141 = tpu.reciprocal %140 {approx = true} : vector<2x8x1xf32> -> vector<2x8x1xf32>
    %142 = vector.broadcast %141 : vector<2x8x1xf32> to vector<2x8x8xf32>
    %143 = arith.mulf %138, %142 : vector<2x8x8xf32>
    %144 = vector.extract_strided_slice %54 {offsets = [0, 0, 24], sizes = [2, 8, 8], strides = [1, 1, 1]} : vector<2x8x32xf32> to vector<2x8x8xf32>
    %cst_53 = arith.constant dense<0.000000e+00> : vector<2x8x8xf32>
    %145 = tpu.matmul %143, %144, %cst_53 {dimension_numbers = #tpu.dot_dimension_numbers<[2], [1], [1], [2], [0, 0, 0, 1, 1, 2], [0], [0]>} : vector<2x8x8xf32>, vector<2x8x8xf32>, vector<2x8x8xf32> -> vector<2x8x8xf32>
    %146 = vector.shape_cast %145 : vector<2x8x8xf32> to vector<16x8xf32>
    %147 = vector.extract_strided_slice %50 {offsets = [24, 0], sizes = [8, 32], strides = [1, 1]} : vector<32x32xf32> to vector<8x32xf32>
    %cst_54 = arith.constant dense<0.000000e+00> : vector<16x32xf32>
    %148 = tpu.matmul %146, %147, %cst_54 {dimension_numbers = #tpu.dot_dimension_numbers<[1], [0], [0], [1], [0, 0, 1, 1], [], []>} : vector<16x8xf32>, vector<8x32xf32>, vector<16x32xf32> -> vector<16x32xf32>
    %149 = arith.addf %125, %148 : vector<16x32xf32>
    %150 = vector.broadcast %51 : vector<1x32xf32> to vector<16x32xf32>
    %151 = arith.addf %149, %150 : vector<16x32xf32>
    %152 = arith.addf %1, %151 : vector<16x32xf32>
    %cst_55 = arith.constant dense<0.000000e+00> : vector<16xf32>
    %153 = vector.multi_reduction <add>, %152, %cst_55 [1] : vector<16x32xf32> to vector<16xf32>
    %154 = vector.shape_cast %153 : vector<16xf32> to vector<16x1xf32>
    %cst_56 = arith.constant 3.200000e+01 : f32
    %155 = vector.broadcast %cst_56 : f32 to vector<16x1xf32>
    %156 = arith.divf %154, %155 : vector<16x1xf32>
    %157 = vector.broadcast %156 : vector<16x1xf32> to vector<16x32xf32>
    %158 = arith.subf %152, %157 : vector<16x32xf32>
    %159 = arith.mulf %158, %158 : vector<16x32xf32>
    %cst_57 = arith.constant dense<0.000000e+00> : vector<16xf32>
    %160 = vector.multi_reduction <add>, %159, %cst_57 [1] : vector<16x32xf32> to vector<16xf32>
    %161 = vector.shape_cast %160 : vector<16xf32> to vector<16x1xf32>
    %cst_58 = arith.constant 3.200000e+01 : f32
    %162 = vector.broadcast %cst_58 : f32 to vector<16x1xf32>
    %163 = arith.divf %161, %162 : vector<16x1xf32>
    %164 = vector.broadcast %156 : vector<16x1xf32> to vector<16x32xf32>
    %165 = arith.subf %152, %164 : vector<16x32xf32>
    %cst_59 = arith.constant 9.99999974E-6 : f32
    %166 = vector.broadcast %cst_59 : f32 to vector<16x1xf32>
    %167 = arith.addf %163, %166 : vector<16x1xf32>
    %168 = math.rsqrt %167 : vector<16x1xf32>
    %169 = vector.broadcast %168 : vector<16x1xf32> to vector<16x32xf32>
    %170 = arith.mulf %165, %169 : vector<16x32xf32>
    %171 = vector.broadcast %16 : vector<1x32xf32> to vector<16x32xf32>
    %172 = arith.mulf %170, %171 : vector<16x32xf32>
    %173 = vector.broadcast %17 : vector<1x32xf32> to vector<16x32xf32>
    %174 = arith.addf %172, %173 : vector<16x32xf32>
    %175 = vector.extract_strided_slice %7 {offsets = [0, 0], sizes = [32, 32], strides = [1, 1]} : vector<32x128xf32> to vector<32x32xf32>
    %cst_60 = arith.constant dense<0.000000e+00> : vector<16x32xf32>
    %176 = tpu.matmul %174, %175, %cst_60 {dimension_numbers = #tpu.dot_dimension_numbers<[1], [0], [0], [1], [0, 0, 1, 1], [], []>} : vector<16x32xf32>, vector<32x32xf32>, vector<16x32xf32> -> vector<16x32xf32>
    %177 = vector.extract_strided_slice %11 {offsets = [0, 0], sizes = [1, 32], strides = [1, 1]} : vector<1x128xf32> to vector<1x32xf32>
    %178 = vector.broadcast %177 : vector<1x32xf32> to vector<16x32xf32>
    %179 = arith.addf %176, %178 : vector<16x32xf32>
    %180 = vector.extract_strided_slice %7 {offsets = [0, 32], sizes = [32, 64], strides = [1, 1]} : vector<32x128xf32> to vector<32x64xf32>
    %cst_61 = arith.constant dense<0.000000e+00> : vector<32x64xf32>
    %181 = tpu.matmul %3, %180, %cst_61 {dimension_numbers = #tpu.dot_dimension_numbers<[1], [0], [0], [1], [0, 0, 1, 1], [], []>} : vector<32x32xf32>, vector<32x64xf32>, vector<32x64xf32> -> vector<32x64xf32>
    %182 = vector.extract_strided_slice %11 {offsets = [0, 32], sizes = [1, 64], strides = [1, 1]} : vector<1x128xf32> to vector<1x64xf32>
    %183 = vector.broadcast %182 : vector<1x64xf32> to vector<32x64xf32>
    %184 = arith.addf %181, %183 : vector<32x64xf32>
    %185 = vector.extract_strided_slice %184 {offsets = [0, 0], sizes = [32, 32], strides = [1, 1]} : vector<32x64xf32> to vector<32x32xf32>
    %186 = vector.extract_strided_slice %184 {offsets = [0, 32], sizes = [32, 32], strides = [1, 1]} : vector<32x64xf32> to vector<32x32xf32>
    %187 = vector.extract_strided_slice %7 {offsets = [0, 96], sizes = [32, 32], strides = [1, 1]} : vector<32x128xf32> to vector<32x32xf32>
    %188 = vector.extract_strided_slice %11 {offsets = [0, 96], sizes = [1, 32], strides = [1, 1]} : vector<1x128xf32> to vector<1x32xf32>
    %189 = vector.shape_cast %179 : vector<16x32xf32> to vector<2x8x32xf32>
    %190 = vector.shape_cast %185 : vector<32x32xf32> to vector<2x16x32xf32>
    %191 = vector.shape_cast %186 : vector<32x32xf32> to vector<2x16x32xf32>
    %192 = vector.extract_strided_slice %189 {offsets = [0, 0, 0], sizes = [2, 8, 8], strides = [1, 1, 1]} : vector<2x8x32xf32> to vector<2x8x8xf32>
    %193 = vector.extract_strided_slice %190 {offsets = [0, 0, 0], sizes = [2, 16, 8], strides = [1, 1, 1]} : vector<2x16x32xf32> to vector<2x16x8xf32>
    %cst_62 = arith.constant dense<0.000000e+00> : vector<2x8x16xf32>
    %194 = tpu.matmul %192, %193, %cst_62 {dimension_numbers = #tpu.dot_dimension_numbers<[2], [2], [1], [1], [0, 0, 0, 1, 1, 1], [0], [0]>} : vector<2x8x8xf32>, vector<2x16x8xf32>, vector<2x8x16xf32> -> vector<2x8x16xf32>
    %cst_63 = arith.constant 0.353553385 : f32
    %195 = vector.broadcast %cst_63 : f32 to vector<2x8x16xf32>
    %196 = arith.mulf %194, %195 : vector<2x8x16xf32>
    %197 = vector.broadcast %5 : vector<2x1x16xf32> to vector<2x8x16xf32>
    %198 = arith.addf %196, %197 : vector<2x8x16xf32>
    %cst_64 = arith.constant dense<0xFF800000> : vector<2x8xf32>
    %199 = vector.multi_reduction <maximumf>, %198, %cst_64 [2] : vector<2x8x16xf32> to vector<2x8xf32>
    %200 = vector.shape_cast %199 : vector<2x8xf32> to vector<2x8x1xf32>
    %201 = vector.broadcast %200 : vector<2x8x1xf32> to vector<2x8x16xf32>
    %202 = arith.subf %198, %201 : vector<2x8x16xf32>
    %203 = math.exp %202 : vector<2x8x16xf32>
    %cst_65 = arith.constant dense<0.000000e+00> : vector<2x8xf32>
    %204 = vector.multi_reduction <add>, %203, %cst_65 [2] : vector<2x8x16xf32> to vector<2x8xf32>
    %205 = vector.shape_cast %204 : vector<2x8xf32> to vector<2x8x1xf32>
    %206 = tpu.reciprocal %205 {approx = true} : vector<2x8x1xf32> -> vector<2x8x1xf32>
    %207 = vector.broadcast %206 : vector<2x8x1xf32> to vector<2x8x16xf32>
    %208 = arith.mulf %203, %207 : vector<2x8x16xf32>
    %209 = vector.extract_strided_slice %191 {offsets = [0, 0, 0], sizes = [2, 16, 8], strides = [1, 1, 1]} : vector<2x16x32xf32> to vector<2x16x8xf32>
    %cst_66 = arith.constant dense<0.000000e+00> : vector<2x8x8xf32>
    %210 = tpu.matmul %208, %209, %cst_66 {dimension_numbers = #tpu.dot_dimension_numbers<[2], [1], [1], [2], [0, 0, 0, 1, 1, 2], [0], [0]>} : vector<2x8x16xf32>, vector<2x16x8xf32>, vector<2x8x8xf32> -> vector<2x8x8xf32>
    %211 = vector.shape_cast %210 : vector<2x8x8xf32> to vector<16x8xf32>
    %212 = vector.extract_strided_slice %187 {offsets = [0, 0], sizes = [8, 32], strides = [1, 1]} : vector<32x32xf32> to vector<8x32xf32>
    %cst_67 = arith.constant dense<0.000000e+00> : vector<16x32xf32>
    %213 = tpu.matmul %211, %212, %cst_67 {dimension_numbers = #tpu.dot_dimension_numbers<[1], [0], [0], [1], [0, 0, 1, 1], [], []>} : vector<16x8xf32>, vector<8x32xf32>, vector<16x32xf32> -> vector<16x32xf32>
    %214 = vector.extract_strided_slice %189 {offsets = [0, 0, 8], sizes = [2, 8, 8], strides = [1, 1, 1]} : vector<2x8x32xf32> to vector<2x8x8xf32>
    %215 = vector.extract_strided_slice %190 {offsets = [0, 0, 8], sizes = [2, 16, 8], strides = [1, 1, 1]} : vector<2x16x32xf32> to vector<2x16x8xf32>
    %cst_68 = arith.constant dense<0.000000e+00> : vector<2x8x16xf32>
    %216 = tpu.matmul %214, %215, %cst_68 {dimension_numbers = #tpu.dot_dimension_numbers<[2], [2], [1], [1], [0, 0, 0, 1, 1, 1], [0], [0]>} : vector<2x8x8xf32>, vector<2x16x8xf32>, vector<2x8x16xf32> -> vector<2x8x16xf32>
    %cst_69 = arith.constant 0.353553385 : f32
    %217 = vector.broadcast %cst_69 : f32 to vector<2x8x16xf32>
    %218 = arith.mulf %216, %217 : vector<2x8x16xf32>
    %219 = vector.broadcast %5 : vector<2x1x16xf32> to vector<2x8x16xf32>
    %220 = arith.addf %218, %219 : vector<2x8x16xf32>
    %cst_70 = arith.constant dense<0xFF800000> : vector<2x8xf32>
    %221 = vector.multi_reduction <maximumf>, %220, %cst_70 [2] : vector<2x8x16xf32> to vector<2x8xf32>
    %222 = vector.shape_cast %221 : vector<2x8xf32> to vector<2x8x1xf32>
    %223 = vector.broadcast %222 : vector<2x8x1xf32> to vector<2x8x16xf32>
    %224 = arith.subf %220, %223 : vector<2x8x16xf32>
    %225 = math.exp %224 : vector<2x8x16xf32>
    %cst_71 = arith.constant dense<0.000000e+00> : vector<2x8xf32>
    %226 = vector.multi_reduction <add>, %225, %cst_71 [2] : vector<2x8x16xf32> to vector<2x8xf32>
    %227 = vector.shape_cast %226 : vector<2x8xf32> to vector<2x8x1xf32>
    %228 = tpu.reciprocal %227 {approx = true} : vector<2x8x1xf32> -> vector<2x8x1xf32>
    %229 = vector.broadcast %228 : vector<2x8x1xf32> to vector<2x8x16xf32>
    %230 = arith.mulf %225, %229 : vector<2x8x16xf32>
    %231 = vector.extract_strided_slice %191 {offsets = [0, 0, 8], sizes = [2, 16, 8], strides = [1, 1, 1]} : vector<2x16x32xf32> to vector<2x16x8xf32>
    %cst_72 = arith.constant dense<0.000000e+00> : vector<2x8x8xf32>
    %232 = tpu.matmul %230, %231, %cst_72 {dimension_numbers = #tpu.dot_dimension_numbers<[2], [1], [1], [2], [0, 0, 0, 1, 1, 2], [0], [0]>} : vector<2x8x16xf32>, vector<2x16x8xf32>, vector<2x8x8xf32> -> vector<2x8x8xf32>
    %233 = vector.shape_cast %232 : vector<2x8x8xf32> to vector<16x8xf32>
    %234 = vector.extract_strided_slice %187 {offsets = [8, 0], sizes = [8, 32], strides = [1, 1]} : vector<32x32xf32> to vector<8x32xf32>
    %cst_73 = arith.constant dense<0.000000e+00> : vector<16x32xf32>
    %235 = tpu.matmul %233, %234, %cst_73 {dimension_numbers = #tpu.dot_dimension_numbers<[1], [0], [0], [1], [0, 0, 1, 1], [], []>} : vector<16x8xf32>, vector<8x32xf32>, vector<16x32xf32> -> vector<16x32xf32>
    %236 = arith.addf %213, %235 : vector<16x32xf32>
    %237 = vector.extract_strided_slice %189 {offsets = [0, 0, 16], sizes = [2, 8, 8], strides = [1, 1, 1]} : vector<2x8x32xf32> to vector<2x8x8xf32>
    %238 = vector.extract_strided_slice %190 {offsets = [0, 0, 16], sizes = [2, 16, 8], strides = [1, 1, 1]} : vector<2x16x32xf32> to vector<2x16x8xf32>
    %cst_74 = arith.constant dense<0.000000e+00> : vector<2x8x16xf32>
    %239 = tpu.matmul %237, %238, %cst_74 {dimension_numbers = #tpu.dot_dimension_numbers<[2], [2], [1], [1], [0, 0, 0, 1, 1, 1], [0], [0]>} : vector<2x8x8xf32>, vector<2x16x8xf32>, vector<2x8x16xf32> -> vector<2x8x16xf32>
    %cst_75 = arith.constant 0.353553385 : f32
    %240 = vector.broadcast %cst_75 : f32 to vector<2x8x16xf32>
    %241 = arith.mulf %239, %240 : vector<2x8x16xf32>
    %242 = vector.broadcast %5 : vector<2x1x16xf32> to vector<2x8x16xf32>
    %243 = arith.addf %241, %242 : vector<2x8x16xf32>
    %cst_76 = arith.constant dense<0xFF800000> : vector<2x8xf32>
    %244 = vector.multi_reduction <maximumf>, %243, %cst_76 [2] : vector<2x8x16xf32> to vector<2x8xf32>
    %245 = vector.shape_cast %244 : vector<2x8xf32> to vector<2x8x1xf32>
    %246 = vector.broadcast %245 : vector<2x8x1xf32> to vector<2x8x16xf32>
    %247 = arith.subf %243, %246 : vector<2x8x16xf32>
    %248 = math.exp %247 : vector<2x8x16xf32>
    %cst_77 = arith.constant dense<0.000000e+00> : vector<2x8xf32>
    %249 = vector.multi_reduction <add>, %248, %cst_77 [2] : vector<2x8x16xf32> to vector<2x8xf32>
    %250 = vector.shape_cast %249 : vector<2x8xf32> to vector<2x8x1xf32>
    %251 = tpu.reciprocal %250 {approx = true} : vector<2x8x1xf32> -> vector<2x8x1xf32>
    %252 = vector.broadcast %251 : vector<2x8x1xf32> to vector<2x8x16xf32>
    %253 = arith.mulf %248, %252 : vector<2x8x16xf32>
    %254 = vector.extract_strided_slice %191 {offsets = [0, 0, 16], sizes = [2, 16, 8], strides = [1, 1, 1]} : vector<2x16x32xf32> to vector<2x16x8xf32>
    %cst_78 = arith.constant dense<0.000000e+00> : vector<2x8x8xf32>
    %255 = tpu.matmul %253, %254, %cst_78 {dimension_numbers = #tpu.dot_dimension_numbers<[2], [1], [1], [2], [0, 0, 0, 1, 1, 2], [0], [0]>} : vector<2x8x16xf32>, vector<2x16x8xf32>, vector<2x8x8xf32> -> vector<2x8x8xf32>
    %256 = vector.shape_cast %255 : vector<2x8x8xf32> to vector<16x8xf32>
    %257 = vector.extract_strided_slice %187 {offsets = [16, 0], sizes = [8, 32], strides = [1, 1]} : vector<32x32xf32> to vector<8x32xf32>
    %cst_79 = arith.constant dense<0.000000e+00> : vector<16x32xf32>
    %258 = tpu.matmul %256, %257, %cst_79 {dimension_numbers = #tpu.dot_dimension_numbers<[1], [0], [0], [1], [0, 0, 1, 1], [], []>} : vector<16x8xf32>, vector<8x32xf32>, vector<16x32xf32> -> vector<16x32xf32>
    %259 = arith.addf %236, %258 : vector<16x32xf32>
    %260 = vector.extract_strided_slice %189 {offsets = [0, 0, 24], sizes = [2, 8, 8], strides = [1, 1, 1]} : vector<2x8x32xf32> to vector<2x8x8xf32>
    %261 = vector.extract_strided_slice %190 {offsets = [0, 0, 24], sizes = [2, 16, 8], strides = [1, 1, 1]} : vector<2x16x32xf32> to vector<2x16x8xf32>
    %cst_80 = arith.constant dense<0.000000e+00> : vector<2x8x16xf32>
    %262 = tpu.matmul %260, %261, %cst_80 {dimension_numbers = #tpu.dot_dimension_numbers<[2], [2], [1], [1], [0, 0, 0, 1, 1, 1], [0], [0]>} : vector<2x8x8xf32>, vector<2x16x8xf32>, vector<2x8x16xf32> -> vector<2x8x16xf32>
    %cst_81 = arith.constant 0.353553385 : f32
    %263 = vector.broadcast %cst_81 : f32 to vector<2x8x16xf32>
    %264 = arith.mulf %262, %263 : vector<2x8x16xf32>
    %265 = vector.broadcast %5 : vector<2x1x16xf32> to vector<2x8x16xf32>
    %266 = arith.addf %264, %265 : vector<2x8x16xf32>
    %cst_82 = arith.constant dense<0xFF800000> : vector<2x8xf32>
    %267 = vector.multi_reduction <maximumf>, %266, %cst_82 [2] : vector<2x8x16xf32> to vector<2x8xf32>
    %268 = vector.shape_cast %267 : vector<2x8xf32> to vector<2x8x1xf32>
    %269 = vector.broadcast %268 : vector<2x8x1xf32> to vector<2x8x16xf32>
    %270 = arith.subf %266, %269 : vector<2x8x16xf32>
    %271 = math.exp %270 : vector<2x8x16xf32>
    %cst_83 = arith.constant dense<0.000000e+00> : vector<2x8xf32>
    %272 = vector.multi_reduction <add>, %271, %cst_83 [2] : vector<2x8x16xf32> to vector<2x8xf32>
    %273 = vector.shape_cast %272 : vector<2x8xf32> to vector<2x8x1xf32>
    %274 = tpu.reciprocal %273 {approx = true} : vector<2x8x1xf32> -> vector<2x8x1xf32>
    %275 = vector.broadcast %274 : vector<2x8x1xf32> to vector<2x8x16xf32>
    %276 = arith.mulf %271, %275 : vector<2x8x16xf32>
    %277 = vector.extract_strided_slice %191 {offsets = [0, 0, 24], sizes = [2, 16, 8], strides = [1, 1, 1]} : vector<2x16x32xf32> to vector<2x16x8xf32>
    %cst_84 = arith.constant dense<0.000000e+00> : vector<2x8x8xf32>
    %278 = tpu.matmul %276, %277, %cst_84 {dimension_numbers = #tpu.dot_dimension_numbers<[2], [1], [1], [2], [0, 0, 0, 1, 1, 2], [0], [0]>} : vector<2x8x16xf32>, vector<2x16x8xf32>, vector<2x8x8xf32> -> vector<2x8x8xf32>
    %279 = vector.shape_cast %278 : vector<2x8x8xf32> to vector<16x8xf32>
    %280 = vector.extract_strided_slice %187 {offsets = [24, 0], sizes = [8, 32], strides = [1, 1]} : vector<32x32xf32> to vector<8x32xf32>
    %cst_85 = arith.constant dense<0.000000e+00> : vector<16x32xf32>
    %281 = tpu.matmul %279, %280, %cst_85 {dimension_numbers = #tpu.dot_dimension_numbers<[1], [0], [0], [1], [0, 0, 1, 1], [], []>} : vector<16x8xf32>, vector<8x32xf32>, vector<16x32xf32> -> vector<16x32xf32>
    %282 = arith.addf %259, %281 : vector<16x32xf32>
    %283 = vector.broadcast %188 : vector<1x32xf32> to vector<16x32xf32>
    %284 = arith.addf %282, %283 : vector<16x32xf32>
    %285 = arith.addf %152, %284 : vector<16x32xf32>
    %cst_86 = arith.constant dense<0.000000e+00> : vector<16xf32>
    %286 = vector.multi_reduction <add>, %285, %cst_86 [1] : vector<16x32xf32> to vector<16xf32>
    %287 = vector.shape_cast %286 : vector<16xf32> to vector<16x1xf32>
    %cst_87 = arith.constant 3.200000e+01 : f32
    %288 = vector.broadcast %cst_87 : f32 to vector<16x1xf32>
    %289 = arith.divf %287, %288 : vector<16x1xf32>
    %290 = vector.broadcast %289 : vector<16x1xf32> to vector<16x32xf32>
    %291 = arith.subf %285, %290 : vector<16x32xf32>
    %292 = arith.mulf %291, %291 : vector<16x32xf32>
    %cst_88 = arith.constant dense<0.000000e+00> : vector<16xf32>
    %293 = vector.multi_reduction <add>, %292, %cst_88 [1] : vector<16x32xf32> to vector<16xf32>
    %294 = vector.shape_cast %293 : vector<16xf32> to vector<16x1xf32>
    %cst_89 = arith.constant 3.200000e+01 : f32
    %295 = vector.broadcast %cst_89 : f32 to vector<16x1xf32>
    %296 = arith.divf %294, %295 : vector<16x1xf32>
    %297 = vector.broadcast %289 : vector<16x1xf32> to vector<16x32xf32>
    %298 = arith.subf %285, %297 : vector<16x32xf32>
    %cst_90 = arith.constant 9.99999974E-6 : f32
    %299 = vector.broadcast %cst_90 : f32 to vector<16x1xf32>
    %300 = arith.addf %296, %299 : vector<16x1xf32>
    %301 = math.rsqrt %300 : vector<16x1xf32>
    %302 = vector.broadcast %301 : vector<16x1xf32> to vector<16x32xf32>
    %303 = arith.mulf %298, %302 : vector<16x32xf32>
    %304 = vector.broadcast %18 : vector<1x32xf32> to vector<16x32xf32>
    %305 = arith.mulf %303, %304 : vector<16x32xf32>
    %306 = vector.broadcast %19 : vector<1x32xf32> to vector<16x32xf32>
    %307 = arith.addf %305, %306 : vector<16x32xf32>
    %cst_91 = arith.constant dense<0.000000e+00> : vector<16x64xf32>
    %308 = tpu.matmul %307, %8, %cst_91 {dimension_numbers = #tpu.dot_dimension_numbers<[1], [0], [0], [1], [0, 0, 1, 1], [], []>} : vector<16x32xf32>, vector<32x64xf32>, vector<16x64xf32> -> vector<16x64xf32>
    %309 = vector.broadcast %12 : vector<1x64xf32> to vector<16x64xf32>
    %310 = arith.addf %308, %309 : vector<16x64xf32>
    %cst_92 = arith.constant 0.000000e+00 : f32
    %311 = vector.broadcast %cst_92 : f32 to vector<16x64xf32>
    %312 = arith.maximumf %310, %311 : vector<16x64xf32>
    %cst_93 = arith.constant dense<0.000000e+00> : vector<16x32xf32>
    %313 = tpu.matmul %312, %9, %cst_93 {dimension_numbers = #tpu.dot_dimension_numbers<[1], [0], [0], [1], [0, 0, 1, 1], [], []>} : vector<16x64xf32>, vector<64x32xf32>, vector<16x32xf32> -> vector<16x32xf32>
    %314 = vector.broadcast %13 : vector<1x32xf32> to vector<16x32xf32>
    %315 = arith.addf %313, %314 : vector<16x32xf32>
    %316 = arith.addf %284, %315 : vector<16x32xf32>
    %317 = vector.shape_cast %316 : vector<16x32xf32> to vector<2x8x32xf32>
    %c0_94 = arith.constant 0 : index
    %c0_95 = arith.constant 0 : index
    %c0_96 = arith.constant 0 : index
    %318 = vector.load %arg7[%c0_94, %c0_95, %c0_96] : memref<2x8x32xf32, #tpu.memory_space<vmem>>, vector<2x8x32xf32>
    tpu.vector_store %arg7[%c0_94, %c0_95, %c0_96], %317 {strides = array<i32>} : memref<2x8x32xf32, #tpu.memory_space<vmem>>, vector<2x8x32xf32>,
    return
  }
  func.func @transform_0(%arg0: i32) -> (i32, i32, i32) {
    %c0_i32 = arith.constant 0 : i32
    %c0_i32_0 = arith.constant 0 : i32
    %c0_i32_1 = arith.constant 0 : i32
    return %arg0, %c0_i32, %c0_i32_0 : i32, i32, i32
  }
  func.func @transform_1(%arg0: i32) -> (i32, i32, i32) {
    %c0_i32 = arith.constant 0 : i32
    %c0_i32_0 = arith.constant 0 : i32
    %c0_i32_1 = arith.constant 0 : i32
    return %arg0, %c0_i32, %c0_i32_0 : i32, i32, i32
  }
  func.func @transform_2(%arg0: i32) -> (i32, i32) {
    %c0_i32 = arith.constant 0 : i32
    %c0_i32_0 = arith.constant 0 : i32
    %c0_i32_1 = arith.constant 0 : i32
    return %c0_i32, %c0_i32_0 : i32, i32
  }
  func.func @transform_3(%arg0: i32) -> (i32, i32, i32) {
    %c0_i32 = arith.constant 0 : i32
    %c0_i32_0 = arith.constant 0 : i32
    %c0_i32_1 = arith.constant 0 : i32
    return %arg0, %c0_i32, %c0_i32_0 : i32, i32, i32
  }
  func.func @transform_4(%arg0: i32) -> (i32, i32) {
    %c0_i32 = arith.constant 0 : i32
    %c0_i32_0 = arith.constant 0 : i32
    %c0_i32_1 = arith.constant 0 : i32
    return %c0_i32, %c0_i32_0 : i32, i32
  }
  func.func @transform_5(%arg0: i32) -> (i32, i32) {
    %c0_i32 = arith.constant 0 : i32
    %c0_i32_0 = arith.constant 0 : i32
    %c0_i32_1 = arith.constant 0 : i32
    return %c0_i32, %c0_i32_0 : i32, i32
  }
  func.func @transform_6(%arg0: i32) -> (i32, i32, i32) {
    %c0_i32 = arith.constant 0 : i32
    %c0_i32_0 = arith.constant 0 : i32
    %c0_i32_1 = arith.constant 0 : i32
    return %arg0, %c0_i32, %c0_i32_0 : i32, i32, i32
  }
}

</mosaic_0001>

<bundles_post_ra>
// kernel: tpu_custom_call.1
= control target key start
LH: loop header
LB: loop body
LE: loop exit
PB: predicated region body
PF: predicated region fallthrough
CT: control target
= control target key end

     0   :  { %11 = vsyncpa [#allocation3], 0  ;;  %s5542_s0 = inlined_call_operand.hbm [shape: f32[2,8,32], index: 0, kind: input, shape index: {}]   ;;  %s5543_s1 = inlined_call_operand.hbm [shape: f32[2,16,32], index: 1, kind: input, shape index: {}]   ;;  %s5544_s2 = inlined_call_operand.hbm [shape: f32[8,8], index: 2, kind: input, shape index: {}]   ;;  %s5545_s3 = inlined_call_operand.vmem [shape: f32[2,1,16], index: 3, kind: input, shape index: {}]   ;;  %s5546_s4 = inlined_call_operand.hbm [shape: f32[160,128], index: 4, kind: input, shape index: {}]   ;;  %s5547_s5 = inlined_call_operand.hbm [shape: f32[10,128], index: 5, kind: input, shape index: {}]   ;;  %s5548_s6 = inlined_call_operand.hbm [shape: f32[2,8,32], index: 6, kind: output, shape index: {}]  }
   0x1   :  { %12 = vsyncpa [#allocation6], 0 }
   0x2   :  { %13 = vsyncpa [#allocation9], 0 }
   0x3   :  { %14 = vsyncpa [#allocation4], 0  ;;  %s4921_s21 = smov [#allocation5]   ;;  %s4922_s23 = smov [#allocation8]  }
   0x4   :  { %s32_s22 = sshll.u32 %s4921_s21, 4  ;;  %s56_s24 = sshll.u32 %s4922_s23, 4  ;;  %s33_s22 = int_to_ptr.vmem [resolvable:$true] %s32_s22  ;;  %s57_s24 = int_to_ptr.vmem [resolvable:$true] %s56_s24 }
   0x5   :  { %s4801_s25 = scalar_lea.vmem %s33_s22, 512  ;;  %p4806_p1 = scmp.lt.s32.totalorder %s33_s22, %s33_s22 }
   0x6   :  { %p4802_p0 = scmp.ne.s32.totalorder %s33_s22, %s4801_s25  ;;  %p4807_p2 = scmp.lt.s32.totalorder %s4801_s25, %s4801_s25 }
   0x8   :  { %p4808_p3 = por %p4807_p2, %p4806_p1 }
   0xa   :  { %p4809_p4 = pnand %p4808_p3, %p4802_p0 }
   0xc   :  { %4812 = shalt.err (!%p4809_p4)
}
   0xd   :  { %s4923_s26 = smov 128   ;;  %s4924_s27 = smov 8  }
   0xe   :  { %38 = dma.hbm_to_vmem [thread:$0]  %s5543_s1, 512, %s33_s22, [#allocation6], %s4923_s26, %s4923_s26, %s4924_s27  }
   0xf   :  { %s4821_s30 = scalar_lea.vmem %s57_s24, 2560  ;;  %p4826_p6 = scmp.lt.s32.totalorder %s57_s24, %s57_s24 }
  0x10   :  { %p4822_p5 = scmp.ne.s32.totalorder %s57_s24, %s4821_s30  ;;  %p4827_p7 = scmp.lt.s32.totalorder %s4821_s30, %s4821_s30 }
  0x12   :  { %p4828_p8 = por %p4827_p7, %p4826_p6 }
  0x14   :  { %p4829_p9 = pnand %p4828_p8, %p4822_p5 }
  0x16   :  { %4832 = shalt.err (!%p4829_p9)
}
  0x17   :  { %62 = dma.hbm_to_vmem [thread:$0]  %s5546_s4, 2560, %s57_s24, [#allocation9], %s4923_s26, %s4923_s26, %s4924_s27  }
  0x18   :  { %s4925_s9 = smov [#allocation2]   ;;  %s4926_s11 = smov [#allocation7]  }
  0x19   :  { %s20_s10 = sshll.u32 %s4925_s9, 4  ;;  %s45_s12 = sshll.u32 %s4926_s11, 4  ;;  %s21_s10 = int_to_ptr.vmem [resolvable:$true] %s20_s10  ;;  %s46_s12 = int_to_ptr.vmem [resolvable:$true] %s45_s12 }
  0x1a   :  { %s4841_s1 = scalar_lea.vmem %s21_s10, 256  ;;  %p4846_p11 = scmp.lt.s32.totalorder %s21_s10, %s21_s10 }
  0x1b   :  { %p4842_p10 = scmp.ne.s32.totalorder %s21_s10, %s4841_s1  ;;  %p4847_p12 = scmp.lt.s32.totalorder %s4841_s1, %s4841_s1 }
  0x1d   :  { %p4848_p13 = por %p4847_p12, %p4846_p11 }
  0x1f   :  { %p4849_p0 = pnand %p4848_p13, %p4842_p10 }
  0x21   :  { %4852 = shalt.err (!%p4849_p0)
}
  0x22   :  { %26 = dma.hbm_to_vmem [thread:$0]  %s5542_s0, 256, %s21_s10, [#allocation3], %s4923_s26, %s4923_s26, %s4924_s27  }
  0x23   :  { %s4861_s4 = scalar_lea.vmem %s46_s12, 128  ;;  %p4866_p2 = scmp.lt.s32.totalorder %s46_s12, %s46_s12 }
  0x24   :  { %p4862_p1 = scmp.ne.s32.totalorder %s46_s12, %s4861_s4  ;;  %p4867_p3 = scmp.lt.s32.totalorder %s4861_s4, %s4861_s4 }
  0x26   :  { %p4868_p4 = por %p4867_p3, %p4866_p2 }
  0x28   :  { %p4869_p5 = pnand %p4868_p4, %p4862_p1 }
  0x2a   :  { %4872 = shalt.err (!%p4869_p5)
}
  0x2b   :  { %48 = dma.hbm_to_vmem [thread:$0]  %s5544_s2, 128, %s46_s12, [#allocation6]  }
  0x2c   :  { %s4927_s17 = smov [#allocation10]  }
  0x2d   :  { %s68_s18 = sshll.u32 %s4927_s17, 4  ;;  %s69_s18 = int_to_ptr.vmem [resolvable:$true] %s68_s18 }
  0x2e   :  { %s4881_s19 = scalar_lea.vmem %s69_s18, 256  ;;  %p4886_p7 = scmp.lt.s32.totalorder %s69_s18, %s69_s18 }
  0x2f   :  { %p4882_p6 = scmp.ne.s32.totalorder %s69_s18, %s4881_s19  ;;  %p4887_p8 = scmp.lt.s32.totalorder %s4881_s19, %s4881_s19 }
  0x31   :  { %p4888_p9 = por %p4887_p8, %p4886_p7 }
  0x33   :  { %p4889_p10 = pnand %p4888_p9, %p4882_p6 }
  0x35   :  { %4892 = shalt.err (!%p4889_p10)
}
  0x36   :  { %74 = dma.hbm_to_vmem [thread:$0]  %s5547_s5, 256, %s69_s18, [#allocation9], %s4923_s26, %s4923_s26, %s4924_s27  }
  0x37   :  { %4913 = dma.done.wait [#allocation3], 256  }
  0x38   :  { %4914 = vsyncadd [#allocation3], 4294967040 }
  0x39   :  { %4915 = dma.done.wait [#allocation6], 640  }
  0x3a   :  { %4916 = vsyncadd [#allocation6], 4294966656 }
  0x3b   :  { %4917 = dma.done.wait [#allocation9], 2816  }
  0x3c   :  { %4918 = vsyncadd [#allocation9], 4294964480  ;;  %vm129_vm0 = vcmask 261120   ;;  %v5005_v0 = vld [vmem:[#allocation2] sm:$0xff]  ;;  %v5007_v1 = vld [vmem:[#allocation2 + $0x8] sm:$0xff]  ;;  %v4928_v34 = vmov 0.0  }
  0x3d   :  { %v130_v2 = vsel %vm129_vm0, %v5005_v0, 0.0  ;;  %v133_v3 = vsel %vm129_vm0, %v5007_v1, 0.0  ;;  %v5017_v14 = vld [vmem:[#allocation8 + $0x18] sm:$0xff]  ;;  %v5019_v15 = vld [vmem:[#allocation8 + $0x10] sm:$0xff]  ;;  %v5023_v16 = vld [vmem:[#allocation8 + $0x8] sm:$0xff]  ;;  %4413 = vmatprep.subr.mxu1 %v4928_v34  ;;  %vm4929_vm1 = vmmov 0  }
  0x3e   :  { %131 = vadd.xlane.f32.xlu0 %v130_v2  ;;  %4397 = vmatprep.subr.mxu0 %v5017_v14  ;;  %v5029_v17 = vld [vmem:[#allocation8] sm:$0xff]  ;;  %s4930_s2 = smov 96   ;;  %vm257_vm2 = vcmask 64512   ;;  %v5065_v43 = vld [vmem:[#allocation7] sm:$0xff]  ;;  %s4931_s5 = smov 64   ;;  %vm2355_vm3 = vcmask 130048  }
  0x3f   :  { %4398 = vmatpush3.msra.mxu0 %v5017_v14  ;;  %v4161_v25 = vld [vmem:[#allocation10 + $0x4] ss:$0 sm:$0xff]  ;;  %v4162_v27 = vld [vmem:[#allocation10 + $0x5] ss:$0 sm:$0xff]  ;;  %4415 = vmatprep.mubr.msk.f32.mxu1 %vm4929_vm1, %v4928_v34  ;;  %v5041_v35 = vld [vmem:[#allocation10] ss:$0 sm:$0xff] }
  0x40   :  { %4399 = vmatprep.subr.mxu0 %v5019_v15  ;;  %s4932_s21 = smov 88   ;;  %s4933_s22 = smov 120   ;;  %vm4056_vm4 = vcmask 523264  }
  0x41   :  { %4400 = vmatpush3.msra.mxu0 %v5019_v15  ;;  %s4934_s23 = smov 56   ;;  %s4935_s24 = smov 32  }
  0x42   :  { %134 = vadd.xlane.f32.xlu0 %v133_v3  ;;  %4401 = vmatprep.subr.mxu0 %v5023_v16  ;;  %s4936_s25 = smov 80   ;;  %s4937_s28 = smov 112  }
  0x43   :  { %4402 = vmatpush3.msra.mxu0 %v5023_v16  ;;  %s4938_s29 = smov 48   ;;  %s4939_s30 = smov 72  }
  0x44   :  { %4403 = vmatprep.subr.mxu0 %v5029_v17  ;;  %s4940_s7 = smov 104   ;;  %s4941_s8 = smov 40  }
  0x45   :  { %4404 = vmatpush3.msra.mxu0 %v5029_v17 }
  0x46   :  { %4408 = vmatprep.subr.mxu0 %v4928_v34 }
  0xc7   :  { %v132_v4 = vpop.xlane.xlu0 %131 }
  0xc8   :  { %v137_v5 = vmul.f32 0.03125, %v132_v4 }
  0xca   :  { %v139_v6 = vsub.f32 %v5005_v0, %v137_v5 }
  0xcb   :  { %v135_v7 = vpop.xlane.xlu0 %134 }
  0xcc   :  { %v138_v8 = vmul.f32 0.03125, %v135_v7  ;;  %v141_v9 = vmul.f32 %v139_v6, %v139_v6 }
  0xce   :  { %v140_v10 = vsub.f32 %v5007_v1, %v138_v8  ;;  %v143_v11 = vsel %vm129_vm0, %v141_v9, 0.0 }
  0xcf   :  { %144 = vadd.xlane.f32.xlu1 %v143_v11 }
  0xd0   :  { %v142_v12 = vmul.f32 %v140_v10, %v140_v10 }
  0xd2   :  { %v146_v13 = vsel %vm129_vm0, %v142_v12, 0.0 }
  0xd3   :  { %147 = vadd.xlane.f32.xlu1 %v146_v13 }
 0x158   :  { %v145_v18 = vpop.xlane.xlu1 %144 }
 0x159   :  { %v149_v19 = vmul.f32 0.03125, %v145_v18 }
 0x15b   :  { %v151_v20 = vadd.f32 1e-05, %v149_v19 }
 0x15c   :  { %v148_v21 = vpop.xlane.xlu1 %147 }
 0x15d   :  { %4717 = vrsqrt.f32 %v151_v20  ;;  %v150_v22 = vmul.f32 0.03125, %v148_v21 }
 0x15f   :  { %v152_v23 = vadd.f32 1e-05, %v150_v22 }
 0x161   :  { %4719 = vrsqrt.f32 %v152_v23 }
 0x16a   :  { %v4718_v24 = vpop.eup %4717 }
 0x16b   :  { %v155_v26 = vmul.f32 %v4718_v24, %v139_v6 }
 0x16d   :  { %v161_v28 = vmul.f32 %v4161_v25, %v155_v26 }
 0x16e   :  { %v4720_v29 = vpop.eup %4719 }
 0x16f   :  { %v156_v30 = vmul.f32 %v4720_v29, %v140_v10  ;;  %v167_v31 = vadd.f32 %v4162_v27, %v161_v28 }
 0x171   :  { %v162_v32 = vmul.f32 %v4161_v25, %v156_v30  ;;  %4405 = vmatprep.mubr.msk.f32.mxu0 %vm129_vm0, %v167_v31 }
 0x173   :  { %v168_v33 = vadd.f32 %v4162_v27, %v162_v32 }
 0x175   :  { %4406 = vmatmul.mubr.msk.f32.vlgmr.msra.gmra.mxu0 %vm129_vm0, %v168_v33 }
 0x176   :  { %4410 = vmatprep.mubr.msk.f32.mxu0 %vm4929_vm1, %v4928_v34 }
 0x235   :  { %v4407_v36 = vpop.f32.mrf.mxu0 }
 0x236   :  { %v5044_v37 = vadd.f32 %v4407_v36, %v5041_v35 }
 0x237   :  { %v245_v38 = vpop.f32.mrf.mxu0 }
 0x238   :  { %v5047_v39 = vadd.f32 %v5041_v35, %v245_v38  ;;  %333 = vrot.lane.b32.xlu1 %v5044_v37, %s4930_s2 }
 0x23a   :  { %255 = vrot.lane.b32.xlu0 %v5047_v39, %s4930_s2 }
 0x2aa   :  { %v334_v40 = vpop.permute.xlu1 %333 }
 0x2ab   :  { %4414 = vmatpush3.xpose.msk.msra.mxu1 %vm257_vm2, %v334_v40 }
 0x2ac   :  { %v256_v41 = vpop.permute.xlu0 %255  ;;  %4423 = vmatprep.subr.mxu1 %v4928_v34 }
 0x2ad   :  { %4409 = vmatpush3.xpose.msk.msra.mxu0 %vm257_vm2, %v256_v41 }
 0x2ae   :  { %4416 = vmatmul.mubr.msk.f32.vlgmr.msra.gmra.mxu1 %vm257_vm2, %v5044_v37  ;;  %4418 = vmatprep.subr.mxu0 %v4928_v34 }
 0x2af   :  { %4425 = vmatprep.mubr.msk.f32.mxu1 %vm4929_vm1, %v4928_v34 }
 0x2b0   :  { %4411 = vmatmul.mubr.msk.f32.vlgmr.msra.gmra.mxu0 %vm257_vm2, %v5047_v39 }
 0x2b1   :  { %4420 = vmatprep.mubr.msk.f32.mxu0 %vm4929_vm1, %v4928_v34 }
 0x36e   :  { %v405_v42 = vpop.f32.mrf.mxu1 }
 0x36f   :  { %v410_v44 = vmul.f32 0.35355338, %v405_v42 }
 0x370   :  { %v328_v45 = vpop.f32.mrf.mxu0  ;;  %v4417_v46 = vpop.f32.mrf.mxu1 }
 0x371   :  { %v409_v47 = vmul.f32 0.35355338, %v328_v45  ;;  %v412_v48 = vadd.f32 %v410_v44, %v5065_v43 }
 0x372   :  { %v4412_v49 = vpop.f32.mrf.mxu0 }
 0x373   :  { %v416_v50 = vsel %vm257_vm2, %v412_v48, -inf  ;;  %v411_v51 = vadd.f32 %v409_v47, %v5065_v43 }
 0x374   :  { %417 = vmax.xlane.f32.xlu0 %v416_v50 }
 0x375   :  { %v413_v52 = vsel %vm257_vm2, %v411_v51, -inf }
 0x376   :  { %414 = vmax.xlane.f32.xlu1 %v413_v52 }
 0x3fd   :  { %v418_v53 = vpop.xlane.xlu0 %417 }
 0x3fe   :  { %v420_v54 = vsub.f32 %v412_v48, %v418_v53 }
 0x3ff   :  { %v415_v55 = vpop.xlane.xlu1 %414 }
 0x400   :  { %v423_v56 = vmul.f32 1.442695, %v420_v54  ;;  %v419_v57 = vsub.f32 %v411_v51, %v415_v55 }
 0x402   :  { %4721 = vpow2.f32 %v423_v56  ;;  %v421_v58 = vmul.f32 1.442695, %v419_v57 }
 0x404   :  { %4723 = vpow2.f32 %v421_v58 }
 0x40f   :  { %v4722_v59 = vpop.eup %4721 }
 0x410   :  { %v428_v60 = vsel %vm257_vm2, %v4722_v59, 0.0 }
 0x411   :  { %v4724_v61 = vpop.eup %4723  ;;  %429 = vadd.xlane.f32.xlu1 %v428_v60 }
 0x412   :  { %v425_v62 = vsel %vm257_vm2, %v4724_v61, 0.0 }
 0x413   :  { %426 = vadd.xlane.f32.xlu0 %v425_v62 }
 0x422   :  { %511 = vrot.lane.b32.xlu1 %v5044_v37, %s4931_s5 }
 0x426   :  { %589 = vrot.lane.b32.xlu1 %v5047_v39, %s4932_s21 }
 0x429   :  { %435 = vrot.lane.b32.xlu0 %v5047_v39, %s4931_s5 }
 0x42a   :  { %667 = vrot.lane.b32.xlu1 %v5044_v37, %s4932_s21 }
 0x42d   :  { %587 = vrot.lane.b32.xlu0 %v5047_v39, %s4933_s22 }
 0x42e   :  { %665 = vrot.lane.b32.xlu1 %v5044_v37, %s4933_s22 }
 0x49a   :  { %v430_v63 = vpop.xlane.xlu1 %429 }
 0x49b   :  { %4725 = vrcp.f32 %v430_v63 }
 0x49c   :  { %v427_v2 = vpop.xlane.xlu0 %426 }
 0x49d   :  { %4727 = vrcp.f32 %v427_v2 }
 0x49e   :  { %v512_v3 = vpop.permute.xlu1 %511 }
 0x49f   :  { %4424 = vmatpush3.msra.mxu1 %v512_v3 }
 0x4a0   :  { %v436_v4 = vpop.permute.xlu0 %435  ;;  %4433 = vmatprep.subr.mxu1 %v4928_v34 }
 0x4a1   :  { %4419 = vmatpush3.msra.mxu0 %v436_v4 }
 0x4a2   :  { %v590_v5 = vpop.permute.xlu1 %589  ;;  %4428 = vmatprep.subr.mxu0 %v4928_v34 }
 0x4a4   :  { %v588_v12 = vpop.permute.xlu0 %587 }
 0x4a6   :  { %v668_v7 = vpop.permute.xlu1 %667 }
 0x4a8   :  { %v4726_v6 = vpop.eup %4725 }
 0x4a9   :  { %v434_v8 = vmul.f32 %v4726_v6, %v4722_v59 }
 0x4aa   :  { %v4728_v9 = vpop.eup %4727  ;;  %v666_v11 = vpop.permute.xlu1 %665 }
 0x4ab   :  { %4426 = vmatmul.mubr.msk.f32.vlgmr.msra.gmra.mxu1 %vm257_vm2, %v434_v8  ;;  %v433_v10 = vmul.f32 %v4728_v9, %v4724_v61 }
 0x4ac   :  { %4434 = vmatpush3.xpose.msk.msra.mxu1 %vm257_vm2, %v668_v7  ;;  %4435 = vmatprep.mubr.msk.f32.mxu1 %vm4929_vm1, %v4928_v34 }
 0x4ad   :  { %4421 = vmatmul.mubr.msk.f32.vlgmr.msra.gmra.mxu0 %vm257_vm2, %v433_v10  ;;  %4443 = vmatprep.subr.mxu1 %v4928_v34 }
 0x4ae   :  { %4429 = vmatpush3.xpose.msk.msra.mxu0 %vm257_vm2, %v590_v5  ;;  %4430 = vmatprep.mubr.msk.f32.mxu0 %vm4929_vm1, %v4928_v34 }
 0x4af   :  { %4436 = vmatmul.mubr.msk.f32.vlgmr.msra.gmra.mxu1 %vm257_vm2, %v666_v11  ;;  %4438 = vmatprep.subr.mxu0 %v4928_v34 }
 0x4b0   :  { %4445 = vmatprep.mubr.msk.f32.mxu1 %vm4929_vm1, %v4928_v34 }
 0x4b1   :  { %4431 = vmatmul.mubr.msk.f32.vlgmr.msra.gmra.mxu0 %vm257_vm2, %v588_v12 }
 0x4b2   :  { %4440 = vmatprep.mubr.msk.f32.mxu0 %vm4929_vm1, %v4928_v34 }
 0x56b   :  { %v5101_v13 = vpop.f32.mrf.mxu1 }
 0x56d   :  { %v507_v18 = vpop.f32.mrf.mxu0  ;;  %v4427_v19 = vpop.f32.mrf.mxu1 }
 0x56f   :  { %v4422_v20 = vpop.f32.mrf.mxu0  ;;  %v739_v21 = vpop.f32.mrf.mxu1 }
 0x570   :  { %v744_v22 = vmul.f32 0.35355338, %v739_v21 }
 0x571   :  { %v661_v23 = vpop.f32.mrf.mxu0  ;;  %v4437_v24 = vpop.f32.mrf.mxu1 }
 0x572   :  { %v743_v25 = vmul.f32 0.35355338, %v661_v23  ;;  %v746_v26 = vadd.f32 %v744_v22, %v5065_v43 }
 0x573   :  { %v4432_v27 = vpop.f32.mrf.mxu0 }
 0x574   :  { %v750_v28 = vsel %vm257_vm2, %v746_v26, -inf  ;;  %v745_v29 = vadd.f32 %v743_v25, %v5065_v43 }
 0x575   :  { %751 = vmax.xlane.f32.xlu1 %v750_v28 }
 0x576   :  { %v747_v30 = vsel %vm257_vm2, %v745_v29, -inf }
 0x577   :  { %748 = vmax.xlane.f32.xlu0 %v747_v30 }
 0x586   :  { %845 = vrot.lane.b32.xlu1 %v5044_v37, %s4934_s23 }
 0x58a   :  { %922 = vrot.lane.b32.xlu1 %v5023_v16, %s4935_s24 }
 0x58e   :  { %1007 = vrot.lane.b32.xlu1 %v5029_v17, %s4935_s24 }
 0x592   :  { %1171 = vrot.lane.b32.xlu1 %v5044_v37, %s4936_s25 }
 0x596   :  { %1169 = vrot.lane.b32.xlu1 %v5044_v37, %s4937_s28 }
 0x5fe   :  { %v752_v31 = vpop.xlane.xlu1 %751 }
 0x5ff   :  { %v754_v32 = vsub.f32 %v746_v26, %v752_v31 }
 0x600   :  { %v749_v33 = vpop.xlane.xlu0 %748 }
 0x601   :  { %v757_v36 = vmul.f32 1.442695, %v754_v32  ;;  %v753_v38 = vsub.f32 %v745_v29, %v749_v33 }
 0x602   :  { %v846_v40 = vpop.permute.xlu1 %845 }
 0x603   :  { %4729 = vpow2.f32 %v757_v36  ;;  %v755_v41 = vmul.f32 1.442695, %v753_v38  ;;  %4444 = vmatpush3.msra.mxu1 %v846_v40 }
 0x605   :  { %4731 = vpow2.f32 %v755_v41 }
 0x606   :  { %v923_v16 = vpop.permute.xlu1 %922 }
 0x60a   :  { %v1008_v17 = vpop.permute.xlu1 %1007 }
 0x60b   :  { %4453 = vmatprep.subr.mxu1 %v1008_v17 }
 0x60e   :  { %v1172_v53 = vpop.permute.xlu1 %1171 }
 0x610   :  { %v4730_v42 = vpop.eup %4729 }
 0x611   :  { %v762_v44 = vsel %vm257_vm2, %v4730_v42, 0.0 }
 0x612   :  { %v4732_v45 = vpop.eup %4731  ;;  %763 = vadd.xlane.f32.xlu0 %v762_v44  ;;  %v1170_v55 = vpop.permute.xlu1 %1169 }
 0x613   :  { %v759_v46 = vsel %vm257_vm2, %v4732_v45, 0.0 }
 0x616   :  { %760 = vadd.xlane.f32.xlu0 %v759_v46 }
 0x62c   :  { %769 = vrot.lane.b32.xlu0 %v5047_v39, %s4934_s23 }
 0x630   :  { %1093 = vrot.lane.b32.xlu0 %v5047_v39, %s4936_s25 }
 0x634   :  { %1091 = vrot.lane.b32.xlu0 %v5047_v39, %s4937_s28 }
 0x69b   :  { %v764_v47 = vpop.xlane.xlu0 %763 }
 0x69c   :  { %4733 = vrcp.f32 %v764_v47 }
 0x69f   :  { %v761_v48 = vpop.xlane.xlu0 %760 }
 0x6a0   :  { %4735 = vrcp.f32 %v761_v48 }
 0x6a3   :  { %v770_v49 = vpop.permute.xlu0 %769 }
 0x6a4   :  { %4439 = vmatpush3.msra.mxu0 %v770_v49 }
 0x6a5   :  { %4448 = vmatprep.subr.mxu0 %v923_v16 }
 0x6a7   :  { %v1094_v58 = vpop.permute.xlu0 %1093 }
 0x6a9   :  { %v4734_v50 = vpop.eup %4733 }
 0x6aa   :  { %v768_v51 = vmul.f32 %v4734_v50, %v4730_v42 }
 0x6ab   :  { %v1092_v2 = vpop.permute.xlu0 %1091 }
 0x6ac   :  { %4446 = vmatmul.mubr.msk.f32.vlgmr.msra.gmra.mxu1 %vm257_vm2, %v768_v51 }
 0x6ad   :  { %v4736_v52 = vpop.eup %4735  ;;  %4455 = vmatprep.mubr.msk.f32.mxu1 %vm257_vm2, %v507_v18  ;;  %4454 = vmatpush3.msra.mxu1 %v1008_v17 }
 0x6ae   :  { %4463 = vmatprep.subr.mxu1 %v4928_v34  ;;  %v767_v54 = vmul.f32 %v4736_v52, %v4732_v45 }
 0x6b0   :  { %4441 = vmatmul.mubr.msk.f32.vlgmr.msra.gmra.mxu0 %vm257_vm2, %v767_v54  ;;  %4456 = vmatmul.mubr.msk.f32.vlgmr.msra.gmra.mxu1 %vm257_vm2, %v5101_v13 }
 0x6b1   :  { %4464 = vmatpush3.xpose.msk.msra.mxu1 %vm257_vm2, %v1172_v53  ;;  %4465 = vmatprep.mubr.msk.f32.mxu1 %vm4929_vm1, %v4928_v34 }
 0x6b2   :  { %4449 = vmatpush3.msra.mxu0 %v923_v16  ;;  %4473 = vmatprep.subr.mxu1 %v4928_v34 }
 0x6b3   :  { %4458 = vmatprep.subr.mxu0 %v4928_v34 }
 0x6b4   :  { %4466 = vmatmul.mubr.msk.f32.vlgmr.msra.gmra.mxu1 %vm257_vm2, %v1170_v55 }
 0x6b5   :  { %4475 = vmatprep.mubr.msk.f32.mxu1 %vm4929_vm1, %v4928_v34 }
 0x76c   :  { %v917_v56 = vpop.f32.mrf.mxu1 }
 0x76e   :  { %v4447_v57 = vpop.f32.mrf.mxu1 }
 0x770   :  { %v841_v59 = vpop.f32.mrf.mxu0  ;;  %v5137_v60 = vpop.f32.mrf.mxu1 }
 0x771   :  { %4450 = vmatprep.mubr.msk.f32.mxu0 %vm257_vm2, %v841_v59 }
 0x772   :  { %v4442_v61 = vpop.f32.mrf.mxu0  ;;  %4451 = vmatmul.mubr.msk.f32.vlgmr.msra.gmra.mxu0 %vm257_vm2, %v917_v56  ;;  %v5141_v62 = vpop.f32.mrf.mxu1 }
 0x773   :  { %4459 = vmatpush3.xpose.msk.msra.mxu0 %vm257_vm2, %v1094_v58  ;;  %4460 = vmatprep.mubr.msk.f32.mxu0 %vm4929_vm1, %v4928_v34 }
 0x774   :  { %v1243_v63 = vpop.f32.mrf.mxu1  ;;  %4468 = vmatprep.subr.mxu0 %v4928_v34 }
 0x775   :  { %v1248_v3 = vmul.f32 0.35355338, %v1243_v63 }
 0x776   :  { %4461 = vmatmul.mubr.msk.f32.vlgmr.msra.gmra.mxu0 %vm257_vm2, %v1092_v2  ;;  %v4467_v4 = vpop.f32.mrf.mxu1 }
 0x777   :  { %v1250_v5 = vadd.f32 %v1248_v3, %v5065_v43  ;;  %4470 = vmatprep.mubr.msk.f32.mxu0 %vm4929_vm1, %v4928_v34 }
 0x779   :  { %v1254_v6 = vsel %vm257_vm2, %v1250_v5, -inf }
 0x77a   :  { %1255 = vmax.xlane.f32.xlu1 %v1254_v6 }
 0x78b   :  { %1349 = vrot.lane.b32.xlu1 %v5044_v37, %s4938_s29 }
 0x78f   :  { %1426 = vrot.lane.b32.xlu1 %v5019_v15, %s4935_s24 }
 0x793   :  { %1514 = vrot.lane.b32.xlu1 %v5047_v39, %s4939_s30 }
 0x797   :  { %1512 = vrot.lane.b32.xlu1 %v5047_v39, %s4940_s7 }
 0x803   :  { %v1256_v7 = vpop.xlane.xlu1 %1255 }
 0x804   :  { %v1258_v9 = vsub.f32 %v1250_v5, %v1256_v7 }
 0x806   :  { %v1261_v10 = vmul.f32 1.442695, %v1258_v9 }
 0x807   :  { %v1350_v8 = vpop.permute.xlu1 %1349 }
 0x808   :  { %4474 = vmatpush3.msra.mxu1 %v1350_v8  ;;  %4737 = vpow2.f32 %v1261_v10 }
 0x809   :  { %4483 = vmatprep.subr.mxu1 %v4928_v34 }
 0x80b   :  { %v1427_v27 = vpop.permute.xlu1 %1426 }
 0x80f   :  { %v1515_v30 = vpop.permute.xlu1 %1514 }
 0x813   :  { %v1513_v33 = vpop.permute.xlu1 %1512 }
 0x815   :  { %v4738_v21 = vpop.eup %4737 }
 0x816   :  { %v1266_v22 = vsel %vm257_vm2, %v4738_v21, 0.0 }
 0x832   :  { %v5161_v11 = vpop.f32.mrf.mxu0 }
 0x833   :  { %v1088_v53 = vadd.f32 %v5137_v60, %v5161_v11 }
 0x834   :  { %v5163_v12 = vpop.f32.mrf.mxu0 }
 0x835   :  { %v1083_v55 = vadd.f32 %v5141_v62, %v5163_v12 }
 0x836   :  { %v1165_v15 = vpop.f32.mrf.mxu0 }
 0x837   :  { %v1247_v13 = vmul.f32 0.35355338, %v1165_v15 }
 0x838   :  { %v4462_v18 = vpop.f32.mrf.mxu0 }
 0x839   :  { %v1249_v19 = vadd.f32 %v1247_v13, %v5065_v43 }
 0x83b   :  { %v1251_v20 = vsel %vm257_vm2, %v1249_v19, -inf }
 0x83c   :  { %1252 = vmax.xlane.f32.xlu0 %v1251_v20 }
 0x840   :  { %1267 = vadd.xlane.f32.xlu0 %v1266_v22 }
 0x8c5   :  { %v1253_v23 = vpop.xlane.xlu0 %1252 }
 0x8c6   :  { %v1257_v24 = vsub.f32 %v1249_v19, %v1253_v23 }
 0x8c8   :  { %v1259_v25 = vmul.f32 1.442695, %v1257_v24 }
 0x8c9   :  { %v1268_v26 = vpop.xlane.xlu0 %1267 }
 0x8ca   :  { %4739 = vpow2.f32 %v1259_v25 }
 0x8cb   :  { %4741 = vrcp.f32 %v1268_v26 }
 0x8d7   :  { %v4740_v28 = vpop.eup %4739 }
 0x8d8   :  { %v4742_v29 = vpop.eup %4741  ;;  %v1263_v31 = vsel %vm257_vm2, %v4740_v28, 0.0 }
 0x8d9   :  { %1264 = vadd.xlane.f32.xlu0 %v1263_v31  ;;  %v1272_v32 = vmul.f32 %v4742_v29, %v4738_v21 }
 0x8db   :  { %4476 = vmatmul.mubr.msk.f32.vlgmr.msra.gmra.mxu1 %vm257_vm2, %v1272_v32 }
 0x8dc   :  { %4484 = vmatpush3.xpose.msk.msra.mxu1 %vm257_vm2, %v1515_v30  ;;  %4485 = vmatprep.mubr.msk.f32.mxu1 %vm4929_vm1, %v4928_v34 }
 0x8dd   :  { %4493 = vmatprep.subr.mxu1 %v4928_v34 }
 0x8df   :  { %4486 = vmatmul.mubr.msk.f32.vlgmr.msra.gmra.mxu1 %vm257_vm2, %v1513_v33  ;;  %v5226_v33 = vld [vmem:[#allocation8 + $0x38] sm:$0xff] }
 0x8e0   :  { %4495 = vmatprep.mubr.msk.f32.mxu1 %vm4929_vm1, %v4928_v34 }
 0x8ef   :  { %1273 = vrot.lane.b32.xlu0 %v5047_v39, %s4938_s29 }
 0x8f3   :  { %1592 = vrot.lane.b32.xlu0 %v5044_v37, %s4939_s30 }
 0x8f7   :  { %1590 = vrot.lane.b32.xlu0 %v5044_v37, %s4940_s7 }
 0x962   :  { %v1265_v36 = vpop.xlane.xlu0 %1264 }
 0x963   :  { %4743 = vrcp.f32 %v1265_v36  ;;  %v5233_v36 = vld [vmem:[#allocation8 + $0x30] sm:$0xff] }
 0x966   :  { %v1274_v38 = vpop.permute.xlu0 %1273 }
 0x967   :  { %4469 = vmatpush3.msra.mxu0 %v1274_v38 }
 0x968   :  { %4478 = vmatprep.subr.mxu0 %v1427_v27 }
 0x96a   :  { %v1593_v49 = vpop.permute.xlu0 %1592 }
 0x970   :  { %v4744_v40 = vpop.eup %4743 }
 0x971   :  { %v1271_v41 = vmul.f32 %v4744_v40, %v4740_v28 }
 0x973   :  { %4471 = vmatmul.mubr.msk.f32.vlgmr.msra.gmra.mxu0 %vm257_vm2, %v1271_v41 }
 0x974   :  { %4479 = vmatpush3.msra.mxu0 %v1427_v27 }
 0x975   :  { %4488 = vmatprep.subr.mxu0 %v4928_v34 }
 0x99b   :  { %v1421_v16 = vpop.f32.mrf.mxu1 }
 0x99d   :  { %v4477_v17 = vpop.f32.mrf.mxu1 }
 0x99f   :  { %v1586_v42 = vpop.f32.mrf.mxu1 }
 0x9a0   :  { %v1668_v44 = vmul.f32 0.35355338, %v1586_v42 }
 0x9a1   :  { %v4487_v45 = vpop.f32.mrf.mxu1 }
 0x9a2   :  { %v1670_v46 = vadd.f32 %v1668_v44, %v5065_v43 }
 0x9a4   :  { %v1672_v47 = vsel %vm257_vm2, %v1670_v46, -inf }
 0x9a5   :  { %1673 = vmax.xlane.f32.xlu1 %v1672_v47 }
 0x9b6   :  { %1694 = vrot.lane.b32.xlu1 %v5047_v39, %s4941_s8 }
 0x9ba   :  { %1847 = vrot.lane.b32.xlu1 %v5017_v14, %s4935_s24  ;;  %v1591_v14 = vpop.permute.xlu0 %1590 }
 0x9be   :  { %1934 = vrot.lane.b32.xlu1 %v5041_v35, %s4935_s24 }
 0xa2e   :  { %v1674_v48 = vpop.xlane.xlu1 %1673 }
 0xa2f   :  { %v1678_v35 = vsub.f32 %v1670_v46, %v1674_v48 }
 0xa31   :  { %v1680_v39 = vmul.f32 1.442695, %v1678_v35 }
 0xa32   :  { %v1695_v50 = vpop.permute.xlu1 %1694 }
 0xa33   :  { %4494 = vmatpush3.msra.mxu1 %v1695_v50  ;;  %v1345_v51 = vpop.f32.mrf.mxu0  ;;  %4745 = vpow2.f32 %v1680_v39  ;;  %v5256_v50 = vld [vmem:[#allocation10 + $0x1] ss:$0 sm:$0xff] }
 0xa34   :  { %4480 = vmatprep.mubr.msk.f32.mxu0 %vm257_vm2, %v1345_v51 }
 0xa35   :  { %v4472_v52 = vpop.f32.mrf.mxu0  ;;  %4481 = vmatmul.mubr.msk.f32.vlgmr.msra.gmra.mxu0 %vm257_vm2, %v1421_v16 }
 0xa36   :  { %4489 = vmatpush3.xpose.msk.msra.mxu0 %vm257_vm2, %v1593_v49  ;;  %4490 = vmatprep.mubr.msk.f32.mxu0 %vm4929_vm1, %v4928_v34  ;;  %v92_v49 = vld [vmem:[#allocation5] sm:$0xff] }
 0xa37   :  { %4498 = vmatprep.subr.mxu0 %v4928_v34 }
 0xa39   :  { %4491 = vmatmul.mubr.msk.f32.vlgmr.msra.gmra.mxu0 %vm257_vm2, %v1591_v14 }
 0xa3a   :  { %4500 = vmatprep.mubr.msk.f32.mxu0 %vm4929_vm1, %v4928_v34 }
 0xa40   :  { %v4746_v4 = vpop.eup %4745 }
 0xa41   :  { %v1684_v5 = vsel %vm257_vm2, %v4746_v4, 0.0 }
 0xaf5   :  { %v4482_v54 = vpop.f32.mrf.mxu0 }
 0xaf6   :  { %v1511_v56 = vadd.f32 %v4482_v54, %v1088_v53 }
 0xaf7   :  { %v1501_v57 = vpop.f32.mrf.mxu0 }
 0xaf8   :  { %v1510_v58 = vadd.f32 %v1501_v57, %v1083_v55  ;;  %v93_v57 = vld [vmem:[#allocation5 + $0x8] sm:$0xff] }
 0xaf9   :  { %v1664_v59 = vpop.f32.mrf.mxu0 }
 0xafa   :  { %v1669_v61 = vmul.f32 0.35355338, %v1664_v59  ;;  %v95_v59 = vld [vmem:[#allocation5 + $0x18] sm:$0xff] }
 0xafb   :  { %v4492_v63 = vpop.f32.mrf.mxu0 }
 0xafc   :  { %v1671_v2 = vadd.f32 %v1669_v61, %v5065_v43  ;;  %v1848_v43 = vpop.permute.xlu1 %1847 }
 0xafd   :  { %4503 = vmatprep.subr.mxu1 %v1848_v43 }
 0xafe   :  { %v1675_v3 = vsel %vm257_vm2, %v1671_v2, -inf }
 0xaff   :  { %1676 = vmax.xlane.f32.xlu0 %v1675_v3 }
 0xb00   :  { %v1935_v23 = vpop.permute.xlu1 %1934 }
 0xb03   :  { %1685 = vadd.xlane.f32.xlu0 %v1684_v5 }
 0xb88   :  { %v1677_v60 = vpop.xlane.xlu0 %1676 }
 0xb89   :  { %v1679_v6 = vsub.f32 %v1671_v2, %v1677_v60  ;;  %v4198_v2 = vld [vmem:[#allocation10 + $0x6] ss:$0 sm:$0xff]  ;;  %v4199_v60 = vld [vmem:[#allocation10 + $0x7] ss:$0 sm:$0xff] }
 0xb8b   :  { %v1682_v7 = vmul.f32 1.442695, %v1679_v6 }
 0xb8c   :  { %v1686_v8 = vpop.xlane.xlu0 %1685 }
 0xb8d   :  { %4747 = vpow2.f32 %v1682_v7 }
 0xb8e   :  { %4749 = vrcp.f32 %v1686_v8 }
 0xb9a   :  { %v4748_v62 = vpop.eup %4747 }
 0xb9b   :  { %v4750_v9 = vpop.eup %4749  ;;  %v1687_v10 = vsel %vm257_vm2, %v4748_v62, 0.0 }
 0xb9c   :  { %1688 = vadd.xlane.f32.xlu0 %v1687_v10  ;;  %v1692_v11 = vmul.f32 %v4750_v9, %v4746_v4 }
 0xb9e   :  { %4496 = vmatmul.mubr.msk.f32.vlgmr.msra.gmra.mxu1 %vm257_vm2, %v1692_v11 }
 0xb9f   :  { %4504 = vmatpush3.msra.mxu1 %v1848_v43 }
 0xbb2   :  { %1770 = vrot.lane.b32.xlu0 %v5044_v37, %s4941_s8 }
 0xc25   :  { %v1689_v12 = vpop.xlane.xlu0 %1688 }
 0xc26   :  { %4751 = vrcp.f32 %v1689_v12 }
 0xc29   :  { %v1771_v15 = vpop.permute.xlu0 %1770 }
 0xc2a   :  { %4499 = vmatpush3.msra.mxu0 %v1771_v15 }
 0xc2b   :  { %4508 = vmatprep.subr.mxu0 %v5226_v33 }
 0xc33   :  { %v4752_v13 = vpop.eup %4751 }
 0xc34   :  { %v1693_v18 = vmul.f32 %v4752_v13, %v4748_v62 }
 0xc36   :  { %4501 = vmatmul.mubr.msk.f32.vlgmr.msra.gmra.mxu0 %vm257_vm2, %v1693_v18 }
 0xc37   :  { %4509 = vmatpush3.msra.mxu0 %v5226_v33 }
 0xc38   :  { %4510 = vmatprep.subr.mxu0 %v5233_v36 }
 0xc39   :  { %4511 = vmatpush3.msra.mxu0 %v5233_v36 }
 0xc5e   :  { %v1766_v19 = vpop.f32.mrf.mxu1 }
 0xc5f   :  { %4505 = vmatprep.mubr.msk.f32.mxu1 %vm257_vm2, %v1766_v19 }
 0xc60   :  { %v4497_v20 = vpop.f32.mrf.mxu1 }
 0xcf6   :  { %v1842_v21 = vpop.f32.mrf.mxu0 }
 0xcf7   :  { %4506 = vmatmul.mubr.msk.f32.vlgmr.msra.gmra.mxu1 %vm257_vm2, %v1842_v21 }
 0xcf8   :  { %v4502_v22 = vpop.f32.mrf.mxu0  ;;  %4527 = vmatprep.mubr.msk.f32.mxu1 %vm129_vm0, %v92_v49 }
 0xdb7   :  { %v4507_v37 = vpop.f32.mrf.mxu1 }
 0xdb8   :  { %v1932_v24 = vadd.f32 %v4507_v37, %v1511_v56 }
 0xdb9   :  { %v1922_v25 = vpop.f32.mrf.mxu1 }
 0xdba   :  { %v1938_v26 = vadd.f32 %v1935_v23, %v1932_v24  ;;  %v1931_v27 = vadd.f32 %v1922_v25, %v1510_v58  ;;  %v94_v58 = vld [vmem:[#allocation5 + $0x10] sm:$0xff] }
 0xdbc   :  { %v5217_v28 = vadd.f32 %v1938_v26, %v5007_v1  ;;  %v1937_v29 = vadd.f32 %v1935_v23, %v1931_v27  ;;  %v5231_v1 = vld [vmem:[#allocation8 + $0x28] sm:$0xff] }
 0xdbd   :  { %4512 = vmatprep.subr.mxu0 %v5231_v1  ;;  %v5307_v23 = vld [vmem:[%s5545_s3 + $0x1] ss:$0 sm:$0xff]  ;;  %v5312_v27 = vld [vmem:[%s5545_s3] ss:$0 sm:$0xff]  ;;  %s4942_s3 = smov [#allocation11]  }
 0xdbe   :  { %v5220_v30 = vadd.f32 %v1937_v29, %v5005_v0  ;;  %v1944_v31 = vsel %vm129_vm0, %v5217_v28, 0.0  ;;  %4513 = vmatpush3.msra.mxu0 %v5231_v1  ;;  %v5242_v0 = vld [vmem:[#allocation8 + $0x20] sm:$0xff]  ;;  %s4147_s1 = sshll.u32 %s4942_s3, 4  ;;  %s4148_s1 = int_to_ptr.vmem [resolvable:$true] %s4147_s1 }
 0xdbf   :  { %1945 = vadd.xlane.f32.xlu0 %v1944_v31  ;;  %4514 = vmatprep.subr.mxu0 %v5242_v0  ;;  %s4893_s13 = scalar_lea.vmem %s4148_s1, 256  ;;  %p4898_p12 = scmp.lt.s32.totalorder %s4148_s1, %s4148_s1 }
 0xdc0   :  { %v1941_v32 = vsel %vm129_vm0, %v5220_v30, 0.0  ;;  %4515 = vmatpush3.msra.mxu0 %v5242_v0  ;;  %p4894_p11 = scmp.ne.s32.totalorder %s4148_s1, %s4893_s13  ;;  %p4899_p13 = scmp.lt.s32.totalorder %s4893_s13, %s4893_s13 }
 0xdc1   :  { %1942 = vadd.xlane.f32.xlu1 %v1941_v32  ;;  %4533 = vmatprep.subr.mxu0 %v4928_v34 }
 0xdc2   :  { %p4900_p0 = por %p4899_p13, %p4898_p12 }
 0xdc4   :  { %p4901_p1 = pnand %p4900_p0, %p4894_p11 }
 0xdd2   :  { %2074 = vrot.lane.b32.xlu1 %v5226_v33, %s4930_s2 }
 0xdd6   :  { %2070 = vrot.lane.b32.xlu1 %v5231_v1, %s4930_s2 }
 0xdda   :  { %2068 = vrot.lane.b32.xlu1 %v5242_v0, %s4930_s2 }
 0xdde   :  { %2081 = vrot.lane.b32.xlu1 %v5256_v50, %s4930_s2 }
 0xe48   :  { %v1946_v38 = vpop.xlane.xlu0 %1945 }
 0xe49   :  { %v1948_v40 = vmul.f32 0.03125, %v1946_v38 }
 0xe4a   :  { %v1943_v41 = vpop.xlane.xlu1 %1942 }
 0xe4b   :  { %v1950_v16 = vsub.f32 %v5217_v28, %v1948_v40  ;;  %v1947_v17 = vmul.f32 0.03125, %v1943_v41 }
 0xe4d   :  { %v1949_v42 = vsub.f32 %v5220_v30, %v1947_v17  ;;  %v1952_v44 = vmul.f32 %v1950_v16, %v1950_v16 }
 0xe4e   :  { %v2075_v48 = vpop.permute.xlu1 %2074 }
 0xe4f   :  { %v1956_v45 = vsel %vm129_vm0, %v1952_v44, 0.0  ;;  %v1951_v46 = vmul.f32 %v1949_v42, %v1949_v42  ;;  %4519 = vmatprep.subr.mxu1 %v2075_v48 }
 0xe50   :  { %1957 = vadd.xlane.f32.xlu0 %v1956_v45  ;;  %4520 = vmatpush3.msra.mxu1 %v2075_v48 }
 0xe51   :  { %v1953_v47 = vsel %vm129_vm0, %v1951_v46, 0.0 }
 0xe52   :  { %v2071_v39 = vpop.permute.xlu1 %2070 }
 0xe54   :  { %1954 = vadd.xlane.f32.xlu0 %v1953_v47 }
 0xe56   :  { %v2069_v56 = vpop.permute.xlu1 %2068 }
 0xe5a   :  { %v2082_v62 = vpop.permute.xlu1 %2081 }
 0xe6a   :  { %2072 = vrot.lane.b32.xlu0 %v5233_v36, %s4930_s2 }
 0xed9   :  { %v1958_v51 = vpop.xlane.xlu0 %1957 }
 0xeda   :  { %v1960_v52 = vmul.f32 0.03125, %v1958_v51 }
 0xedc   :  { %v1962_v14 = vadd.f32 1e-05, %v1960_v52 }
 0xedd   :  { %v1955_v35 = vpop.xlane.xlu0 %1954 }
 0xede   :  { %4753 = vrsqrt.f32 %v1962_v14  ;;  %v1959_v53 = vmul.f32 0.03125, %v1955_v35 }
 0xee0   :  { %v1961_v54 = vadd.f32 1e-05, %v1959_v53 }
 0xee1   :  { %v2073_v55 = vpop.permute.xlu0 %2072 }
 0xee2   :  { %4755 = vrsqrt.f32 %v1961_v54  ;;  %4521 = vmatprep.subr.mxu1 %v2073_v55 }
 0xee3   :  { %4522 = vmatpush3.msra.mxu1 %v2073_v55 }
 0xee4   :  { %4523 = vmatprep.subr.mxu1 %v2071_v39 }
 0xee5   :  { %4524 = vmatpush3.msra.mxu1 %v2071_v39 }
 0xee6   :  { %4525 = vmatprep.subr.mxu1 %v2069_v56 }
 0xee7   :  { %4526 = vmatpush3.msra.mxu1 %v2069_v56 }
 0xee8   :  { %4528 = vmatmul.mubr.msk.f32.vlgmr.msra.gmra.mxu1 %vm129_vm0, %v93_v57  ;;  %4540 = vmatprep.subr.mxu1 %v4928_v34 }
 0xee9   :  { %4530 = vmatprep.mubr.msk.f32.mxu1 %vm129_vm0, %v94_v58 }
 0xeeb   :  { %v4754_v61 = vpop.eup %4753 }
 0xeec   :  { %4531 = vmatmul.mubr.msk.f32.gmra.mxu1 %vm129_vm0, %v95_v59  ;;  %v1966_v63 = vmul.f32 %v4754_v61, %v1950_v16 }
 0xeed   :  { %4544 = vmatprep.mubr.msk.f32.mxu1 %vm4929_vm1, %v4928_v34 }
 0xeee   :  { %v1972_v5 = vmul.f32 %v4198_v2, %v1966_v63 }
 0xeef   :  { %v4756_v3 = vpop.eup %4755 }
 0xef0   :  { %v1965_v4 = vmul.f32 %v4756_v3, %v1949_v42  ;;  %v1978_v8 = vadd.f32 %v4199_v60, %v1972_v5 }
 0xef2   :  { %v1971_v6 = vmul.f32 %v4198_v2, %v1965_v4 }
 0xef4   :  { %v1977_v7 = vadd.f32 %v4199_v60, %v1971_v6 }
 0xef6   :  { %4516 = vmatprep.mubr.msk.f32.mxu0 %vm129_vm0, %v1977_v7 }
 0xef7   :  { %4517 = vmatmul.mubr.msk.f32.vlgmr.msra.gmra.mxu0 %vm129_vm0, %v1978_v8 }
 0xef8   :  { %4537 = vmatprep.mubr.msk.f32.mxu0 %vm4929_vm1, %v4928_v34 }
 0xfa8   :  { %v4529_v9 = vpop.f32.mrf.mxu1 }
 0xfa9   :  { %v5270_v10 = vadd.f32 %v4529_v9, %v2082_v62 }
 0xfaa   :  { %v2162_v11 = vpop.f32.mrf.mxu1 }
 0xfab   :  { %v5272_v43 = vadd.f32 %v2162_v11, %v2082_v62  ;;  %4534 = vmatpush3.xpose.msk.msra.mxu0 %vm257_vm2, %v5270_v10 }
 0xfac   :  { %v4532_v12 = vpop.f32.mrf.mxu1  ;;  %4535 = vmatprep.subr.mxu0 %v4928_v34 }
 0xfad   :  { %v5277_v15 = vadd.f32 %v4532_v12, %v2082_v62 }
 0xfae   :  { %v2172_v13 = vpop.f32.mrf.mxu1 }
 0xfaf   :  { %v5279_v18 = vadd.f32 %v2172_v13, %v2082_v62  ;;  %4536 = vmatpush3.xpose.msk.msra.mxu0 %vm257_vm2, %v5272_v43  ;;  %4541 = vmatpush3.xpose.msk.msra.mxu1 %vm257_vm2, %v5277_v15 }
 0xfb0   :  { %4542 = vmatprep.subr.mxu1 %v4928_v34  ;;  %4547 = vmatprep.subr.mxu0 %v4928_v34 }
 0xfb3   :  { %4543 = vmatpush3.xpose.msk.msra.mxu1 %vm257_vm2, %v5279_v18 }
 0xfb4   :  { %4554 = vmatprep.subr.mxu1 %v4928_v34 }
 0xfb7   :  { %v4518_v19 = vpop.f32.mrf.mxu0 }
 0xfb8   :  { %v5291_v20 = vadd.f32 %v4518_v19, %v5256_v50 }
 0xfb9   :  { %v2055_v21 = vpop.f32.mrf.mxu0 }
 0xfba   :  { %v5294_v22 = vadd.f32 %v5256_v50, %v2055_v21  ;;  %4545 = vmatmul.mubr.msk.f32.vlgmr.msra.gmra.mxu1 %vm257_vm2, %v5291_v20 }
 0xfbb   :  { %4558 = vmatprep.mubr.msk.f32.mxu1 %vm4929_vm1, %v4928_v34 }
 0xfbc   :  { %4538 = vmatmul.mubr.msk.f32.vlgmr.msra.gmra.mxu0 %vm257_vm2, %v5294_v22 }
 0xfbd   :  { %4551 = vmatprep.mubr.msk.f32.mxu0 %vm4929_vm1, %v4928_v34 }
0x107a   :  { %v2335_v37 = vpop.f32.mrf.mxu1 }
0x107b   :  { %v2340_v24 = vmul.f32 0.35355338, %v2335_v37 }
0x107c   :  { %v2256_v25 = vpop.f32.mrf.mxu0  ;;  %v4546_v26 = vpop.f32.mrf.mxu1 }
0x107d   :  { %v2339_v29 = vmul.f32 0.35355338, %v2256_v25  ;;  %v2354_v31 = vadd.f32 %v5307_v23, %v2340_v24 }
0x107e   :  { %v4539_v32 = vpop.f32.mrf.mxu0 }
0x107f   :  { %v2359_v38 = vsel %vm2355_vm3, %v2354_v31, -inf  ;;  %v2353_v40 = vadd.f32 %v5312_v27, %v2339_v29 }
0x1080   :  { %2360 = vmax.xlane.f32.xlu1 %v2359_v38 }
0x1081   :  { %v2356_v41 = vsel %vm2355_vm3, %v2353_v40, -inf }
0x1082   :  { %2357 = vmax.xlane.f32.xlu0 %v2356_v41 }
0x1091   :  { %2459 = vrot.lane.b32.xlu1 %v5277_v15, %s4930_s2 }
0x1095   :  { %2378 = vrot.lane.b32.xlu1 %v5272_v43, %s4930_s2 }
0x1098   :  { %2380 = vrot.lane.b32.xlu0 %v5270_v10, %s4930_s2 }
0x1099   :  { %2457 = vrot.lane.b32.xlu1 %v5279_v18, %s4930_s2 }
0x109c   :  { %2540 = vrot.lane.b32.xlu0 %v5270_v10, %s4933_s22 }
0x109d   :  { %2622 = vrot.lane.b32.xlu1 %v5277_v15, %s4933_s22 }
0x10a1   :  { %2620 = vrot.lane.b32.xlu1 %v5279_v18, %s4933_s22 }
0x10a5   :  { %2618 = vrot.lane.b32.xlu1 %v5291_v20, %s4933_s22 }
0x1109   :  { %v2361_v16 = vpop.xlane.xlu1 %2360 }
0x110a   :  { %v2363_v17 = vsub.f32 %v2354_v31, %v2361_v16 }
0x110b   :  { %v2358_v42 = vpop.xlane.xlu0 %2357 }
0x110c   :  { %v2366_v44 = vmul.f32 1.442695, %v2363_v17  ;;  %v2362_v45 = vsub.f32 %v2353_v40, %v2358_v42 }
0x110d   :  { %v2460_v46 = vpop.permute.xlu1 %2459 }
0x110e   :  { %4757 = vpow2.f32 %v2366_v44  ;;  %v2364_v47 = vmul.f32 1.442695, %v2362_v45  ;;  %4555 = vmatpush3.msra.mxu1 %v2460_v46 }
0x110f   :  { %v2381_v48 = vpop.permute.xlu0 %2380  ;;  %4556 = vmatprep.subr.mxu1 %v4928_v34 }
0x1110   :  { %4759 = vpow2.f32 %v2364_v47  ;;  %4548 = vmatpush3.msra.mxu0 %v2381_v48 }
0x1111   :  { %v2379_v49 = vpop.permute.xlu1 %2378  ;;  %4549 = vmatprep.subr.mxu0 %v4928_v34 }
0x1112   :  { %4550 = vmatpush3.msra.mxu0 %v2379_v49 }
0x1113   :  { %4561 = vmatprep.subr.mxu0 %v4928_v34  ;;  %v2541_v53 = vpop.permute.xlu0 %2540 }
0x1115   :  { %v2458_v51 = vpop.permute.xlu1 %2457 }
0x1116   :  { %4557 = vmatpush3.msra.mxu1 %v2458_v51 }
0x1117   :  { %4568 = vmatprep.subr.mxu1 %v4928_v34 }
0x1119   :  { %v2623_v56 = vpop.permute.xlu1 %2622 }
0x111b   :  { %v4758_v52 = vpop.eup %4757 }
0x111c   :  { %v2371_v14 = vsel %vm2355_vm3, %v4758_v52, 0.0 }
0x111d   :  { %v4760_v35 = vpop.eup %4759  ;;  %2372 = vadd.xlane.f32.xlu0 %v2371_v14  ;;  %v2621_v61 = vpop.permute.xlu1 %2620 }
0x111e   :  { %v2368_v39 = vsel %vm2355_vm3, %v4760_v35, 0.0 }
0x1121   :  { %2369 = vadd.xlane.f32.xlu0 %v2368_v39  ;;  %v2619_v3 = vpop.permute.xlu1 %2618 }
0x1137   :  { %2538 = vrot.lane.b32.xlu0 %v5272_v43, %s4933_s22 }
0x113b   :  { %2536 = vrot.lane.b32.xlu0 %v5294_v22, %s4933_s22 }
0x11a6   :  { %v2373_v54 = vpop.xlane.xlu0 %2372 }
0x11a7   :  { %4761 = vrcp.f32 %v2373_v54 }
0x11aa   :  { %v2370_v55 = vpop.xlane.xlu0 %2369 }
0x11ab   :  { %4763 = vrcp.f32 %v2370_v55 }
0x11ae   :  { %v2539_v2 = vpop.permute.xlu0 %2538 }
0x11b2   :  { %v2537_v4 = vpop.permute.xlu0 %2536 }
0x11b4   :  { %v4762_v57 = vpop.eup %4761 }
0x11b5   :  { %v2377_v58 = vmul.f32 %v4762_v57, %v4758_v52 }
0x11b7   :  { %4559 = vmatmul.mubr.msk.f32.vlgmr.msra.gmra.mxu1 %vm2355_vm3, %v2377_v58 }
0x11b8   :  { %v4764_v59 = vpop.eup %4763  ;;  %4569 = vmatpush3.xpose.msk.msra.mxu1 %vm257_vm2, %v2623_v56  ;;  %4572 = vmatprep.mubr.msk.f32.mxu1 %vm4929_vm1, %v4928_v34 }
0x11b9   :  { %4570 = vmatprep.subr.mxu1 %v4928_v34  ;;  %v2376_v63 = vmul.f32 %v4764_v59, %v4760_v35 }
0x11bb   :  { %4552 = vmatmul.mubr.msk.f32.vlgmr.msra.gmra.mxu0 %vm2355_vm3, %v2376_v63 }
0x11bc   :  { %4562 = vmatpush3.xpose.msk.msra.mxu0 %vm257_vm2, %v2541_v53  ;;  %4571 = vmatpush3.xpose.msk.msra.mxu1 %vm257_vm2, %v2621_v61 }
0x11bd   :  { %4563 = vmatprep.subr.mxu0 %v4928_v34  ;;  %4565 = vmatprep.mubr.msk.f32.mxu0 %vm4929_vm1, %v4928_v34 }
0x11be   :  { %4582 = vmatprep.subr.mxu1 %v4928_v34 }
0x11bf   :  { %4573 = vmatmul.mubr.msk.f32.vlgmr.msra.gmra.mxu1 %vm257_vm2, %v2619_v3 }
0x11c0   :  { %4564 = vmatpush3.xpose.msk.msra.mxu0 %vm257_vm2, %v2539_v2  ;;  %4586 = vmatprep.mubr.msk.f32.mxu1 %vm4929_vm1, %v4928_v34 }
0x11c1   :  { %4575 = vmatprep.subr.mxu0 %v4928_v34 }
0x11c3   :  { %4566 = vmatmul.mubr.msk.f32.vlgmr.msra.gmra.mxu0 %vm257_vm2, %v2537_v4 }
0x11c4   :  { %4579 = vmatprep.mubr.msk.f32.mxu0 %vm4929_vm1, %v4928_v34 }
0x1277   :  { %v5364_v5 = vpop.f32.mrf.mxu1 }
0x1279   :  { %v4560_v60 = vpop.f32.mrf.mxu1 }
0x127b   :  { %v5366_v6 = vpop.f32.mrf.mxu0 }
0x127d   :  { %v4553_v7 = vpop.f32.mrf.mxu0 }
0x127f   :  { %v2696_v8 = vpop.f32.mrf.mxu1 }
0x1280   :  { %v2701_v62 = vmul.f32 0.35355338, %v2696_v8 }
0x1281   :  { %v4574_v9 = vpop.f32.mrf.mxu1 }
0x1282   :  { %v2703_v11 = vadd.f32 %v5307_v23, %v2701_v62 }
0x1283   :  { %v2614_v12 = vpop.f32.mrf.mxu0 }
0x1284   :  { %v2700_v13 = vmul.f32 0.35355338, %v2614_v12  ;;  %v2707_v19 = vsel %vm2355_vm3, %v2703_v11, -inf }
0x1285   :  { %2708 = vmax.xlane.f32.xlu1 %v2707_v19  ;;  %v4567_v21 = vpop.f32.mrf.mxu0 }
0x1286   :  { %v2702_v37 = vadd.f32 %v5312_v27, %v2700_v13 }
0x1288   :  { %v2704_v24 = vsel %vm2355_vm3, %v2702_v37, -inf }
0x1289   :  { %2705 = vmax.xlane.f32.xlu0 %v2704_v24 }
0x1296   :  { %2807 = vrot.lane.b32.xlu1 %v5277_v15, %s4932_s21 }
0x129a   :  { %2726 = vrot.lane.b32.xlu1 %v5272_v43, %s4932_s21 }
0x129e   :  { %2805 = vrot.lane.b32.xlu1 %v5279_v18, %s4932_s21 }
0x12a2   :  { %2968 = vrot.lane.b32.xlu1 %v5242_v0, %s4935_s24 }
0x12a6   :  { %3138 = vrot.lane.b32.xlu1 %v5277_v15, %s4937_s28 }
0x12aa   :  { %3136 = vrot.lane.b32.xlu1 %v5279_v18, %s4937_s28 }
0x12ae   :  { %3134 = vrot.lane.b32.xlu1 %v5291_v20, %s4937_s28 }
0x130e   :  { %v2709_v25 = vpop.xlane.xlu1 %2708 }
0x130f   :  { %v2711_v26 = vsub.f32 %v2703_v11, %v2709_v25 }
0x1311   :  { %v2714_v29 = vmul.f32 1.442695, %v2711_v26 }
0x1312   :  { %v2808_v31 = vpop.permute.xlu1 %2807  ;;  %v2706_v32 = vpop.xlane.xlu0 %2705 }
0x1313   :  { %4765 = vpow2.f32 %v2714_v29  ;;  %v2710_v38 = vsub.f32 %v2702_v37, %v2706_v32  ;;  %4583 = vmatpush3.msra.mxu1 %v2808_v31 }
0x1314   :  { %4584 = vmatprep.subr.mxu1 %v4928_v34 }
0x1315   :  { %v2712_v0 = vmul.f32 1.442695, %v2710_v38 }
0x1316   :  { %v2727_v40 = vpop.permute.xlu1 %2726 }
0x1317   :  { %4767 = vpow2.f32 %v2712_v0 }
0x131a   :  { %v2806_v41 = vpop.permute.xlu1 %2805 }
0x131b   :  { %4585 = vmatpush3.msra.mxu1 %v2806_v41 }
0x131e   :  { %v2969_v16 = vpop.permute.xlu1 %2968 }
0x131f   :  { %4594 = vmatprep.subr.mxu1 %v2969_v16 }
0x1320   :  { %v4766_v17 = vpop.eup %4765 }
0x1321   :  { %v2719_v42 = vsel %vm2355_vm3, %v4766_v17, 0.0 }
0x1322   :  { %2720 = vadd.xlane.f32.xlu0 %v2719_v42  ;;  %v3139_v52 = vpop.permute.xlu1 %3138 }
0x1324   :  { %v4768_v44 = vpop.eup %4767 }
0x1325   :  { %v2716_v45 = vsel %vm2355_vm3, %v4768_v44, 0.0 }
0x1326   :  { %2717 = vadd.xlane.f32.xlu0 %v2716_v45  ;;  %v3137_v39 = vpop.permute.xlu1 %3136 }
0x132a   :  { %v3135_v53 = vpop.permute.xlu1 %3134 }
0x133c   :  { %2728 = vrot.lane.b32.xlu0 %v5270_v10, %s4932_s21 }
0x1340   :  { %2884 = vrot.lane.b32.xlu0 %v5231_v1, %s4935_s24 }
0x1344   :  { %3056 = vrot.lane.b32.xlu0 %v5270_v10, %s4937_s28 }
0x1348   :  { %3054 = vrot.lane.b32.xlu0 %v5272_v43, %s4937_s28 }
0x134c   :  { %3052 = vrot.lane.b32.xlu0 %v5294_v22, %s4937_s28 }
0x13ab   :  { %v2721_v46 = vpop.xlane.xlu0 %2720 }
0x13ac   :  { %4769 = vrcp.f32 %v2721_v46 }
0x13af   :  { %v2718_v47 = vpop.xlane.xlu0 %2717 }
0x13b0   :  { %4771 = vrcp.f32 %v2718_v47 }
0x13b3   :  { %v2729_v48 = vpop.permute.xlu0 %2728 }
0x13b4   :  { %4576 = vmatpush3.msra.mxu0 %v2729_v48 }
0x13b5   :  { %4577 = vmatprep.subr.mxu0 %v4928_v34 }
0x13b6   :  { %4578 = vmatpush3.msra.mxu0 %v2727_v40 }
0x13b7   :  { %v2885_v49 = vpop.permute.xlu0 %2884 }
0x13b8   :  { %4589 = vmatprep.subr.mxu0 %v2885_v49 }
0x13b9   :  { %v4770_v1 = vpop.eup %4769 }
0x13ba   :  { %v2725_v51 = vmul.f32 %v4770_v1, %v4766_v17 }
0x13bb   :  { %v3057_v55 = vpop.permute.xlu0 %3056 }
0x13bc   :  { %4587 = vmatmul.mubr.msk.f32.vlgmr.msra.gmra.mxu1 %vm2355_vm3, %v2725_v51 }
0x13bd   :  { %v4772_v14 = vpop.eup %4771  ;;  %4596 = vmatprep.mubr.msk.f32.mxu1 %vm257_vm2, %v5366_v6  ;;  %4595 = vmatpush3.msra.mxu1 %v2969_v16 }
0x13be   :  { %4606 = vmatprep.subr.mxu1 %v4928_v34  ;;  %v2724_v35 = vmul.f32 %v4772_v14, %v4768_v44 }
0x13bf   :  { %v3055_v61 = vpop.permute.xlu0 %3054 }
0x13c0   :  { %4580 = vmatmul.mubr.msk.f32.vlgmr.msra.gmra.mxu0 %vm2355_vm3, %v2724_v35  ;;  %4597 = vmatmul.mubr.msk.f32.vlgmr.msra.gmra.mxu1 %vm257_vm2, %v5364_v5 }
0x13c1   :  { %4607 = vmatpush3.xpose.msk.msra.mxu1 %vm257_vm2, %v3139_v52  ;;  %4610 = vmatprep.mubr.msk.f32.mxu1 %vm4929_vm1, %v4928_v34 }
0x13c2   :  { %4608 = vmatprep.subr.mxu1 %v4928_v34  ;;  %4590 = vmatpush3.msra.mxu0 %v2885_v49 }
0x13c3   :  { %4599 = vmatprep.subr.mxu0 %v4928_v34  ;;  %v3053_v3 = vpop.permute.xlu0 %3052 }
0x13c5   :  { %4609 = vmatpush3.xpose.msk.msra.mxu1 %vm257_vm2, %v3137_v39 }
0x13c6   :  { %4620 = vmatprep.subr.mxu1 %v4928_v34 }
0x13c8   :  { %4611 = vmatmul.mubr.msk.f32.vlgmr.msra.gmra.mxu1 %vm257_vm2, %v3135_v53 }
0x13c9   :  { %4624 = vmatprep.mubr.msk.f32.mxu1 %vm4929_vm1, %v4928_v34 }
0x147c   :  { %v2880_v54 = vpop.f32.mrf.mxu1 }
0x147e   :  { %v4588_v56 = vpop.f32.mrf.mxu1 }
0x1480   :  { %v2801_v57 = vpop.f32.mrf.mxu0  ;;  %v5418_v58 = vpop.f32.mrf.mxu1 }
0x1481   :  { %4591 = vmatprep.mubr.msk.f32.mxu0 %vm257_vm2, %v2801_v57 }
0x1482   :  { %v4581_v59 = vpop.f32.mrf.mxu0  ;;  %4592 = vmatmul.mubr.msk.f32.vlgmr.msra.gmra.mxu0 %vm257_vm2, %v2880_v54  ;;  %v5425_v63 = vpop.f32.mrf.mxu1 }
0x1483   :  { %4600 = vmatpush3.xpose.msk.msra.mxu0 %vm257_vm2, %v3057_v55  ;;  %4603 = vmatprep.mubr.msk.f32.mxu0 %vm4929_vm1, %v4928_v34 }
0x1484   :  { %4601 = vmatprep.subr.mxu0 %v4928_v34 }
0x1487   :  { %4602 = vmatpush3.xpose.msk.msra.mxu0 %vm257_vm2, %v3055_v61 }
0x1488   :  { %v3212_v2 = vpop.f32.mrf.mxu1  ;;  %4613 = vmatprep.subr.mxu0 %v4928_v34 }
0x1489   :  { %v3217_v4 = vmul.f32 0.35355338, %v3212_v2 }
0x148a   :  { %4604 = vmatmul.mubr.msk.f32.vlgmr.msra.gmra.mxu0 %vm257_vm2, %v3053_v3  ;;  %v4612_v5 = vpop.f32.mrf.mxu1 }
0x148b   :  { %v3219_v60 = vadd.f32 %v5307_v23, %v3217_v4  ;;  %4617 = vmatprep.mubr.msk.f32.mxu0 %vm4929_vm1, %v4928_v34 }
0x148d   :  { %v3223_v6 = vsel %vm2355_vm3, %v3219_v60, -inf }
0x148e   :  { %3224 = vmax.xlane.f32.xlu1 %v3223_v6 }
0x149f   :  { %3323 = vrot.lane.b32.xlu1 %v5277_v15, %s4936_s25 }
0x14a3   :  { %3242 = vrot.lane.b32.xlu1 %v5272_v43, %s4936_s25 }
0x14a7   :  { %3321 = vrot.lane.b32.xlu1 %v5279_v18, %s4936_s25 }
0x14ab   :  { %3490 = vrot.lane.b32.xlu1 %v5270_v10, %s4940_s7 }
0x14af   :  { %3488 = vrot.lane.b32.xlu1 %v5272_v43, %s4940_s7 }
0x14b3   :  { %3486 = vrot.lane.b32.xlu1 %v5294_v22, %s4940_s7 }
0x1517   :  { %v3225_v7 = vpop.xlane.xlu1 %3224 }
0x1518   :  { %v3227_v11 = vsub.f32 %v3219_v60, %v3225_v7 }
0x151a   :  { %v3230_v12 = vmul.f32 1.442695, %v3227_v11 }
0x151b   :  { %v3324_v8 = vpop.permute.xlu1 %3323 }
0x151c   :  { %4621 = vmatpush3.msra.mxu1 %v3324_v8  ;;  %4773 = vpow2.f32 %v3230_v12 }
0x151d   :  { %4622 = vmatprep.subr.mxu1 %v4928_v34 }
0x151f   :  { %v3243_v62 = vpop.permute.xlu1 %3242 }
0x1523   :  { %v3322_v9 = vpop.permute.xlu1 %3321 }
0x1524   :  { %4623 = vmatpush3.msra.mxu1 %v3322_v9 }
0x1525   :  { %4632 = vmatprep.subr.mxu1 %v4928_v34 }
0x1527   :  { %v3491_v40 = vpop.permute.xlu1 %3490 }
0x1529   :  { %v4774_v26 = vpop.eup %4773 }
0x152a   :  { %v3235_v29 = vsel %vm2355_vm3, %v4774_v26, 0.0 }
0x152b   :  { %v3489_v44 = vpop.permute.xlu1 %3488 }
0x152f   :  { %v3487_v45 = vpop.permute.xlu1 %3486 }
0x1542   :  { %v5448_v13 = vpop.f32.mrf.mxu0 }
0x1543   :  { %v3049_v59 = vadd.f32 %v5418_v58, %v5448_v13 }
0x1544   :  { %v5450_v19 = vpop.f32.mrf.mxu0 }
0x1545   :  { %v3044_v2 = vadd.f32 %v5425_v63, %v5450_v19 }
0x154a   :  { %v3130_v21 = vpop.f32.mrf.mxu0 }
0x154b   :  { %v3216_v37 = vmul.f32 0.35355338, %v3130_v21 }
0x154c   :  { %v4605_v22 = vpop.f32.mrf.mxu0 }
0x154d   :  { %v3218_v24 = vadd.f32 %v5312_v27, %v3216_v37 }
0x154f   :  { %v3220_v25 = vsel %vm2355_vm3, %v3218_v24, -inf }
0x1550   :  { %3221 = vmax.xlane.f32.xlu0 %v3220_v25 }
0x1554   :  { %3236 = vadd.xlane.f32.xlu0 %v3235_v29 }
0x15d9   :  { %v3222_v31 = vpop.xlane.xlu0 %3221 }
0x15da   :  { %v3226_v32 = vsub.f32 %v3218_v24, %v3222_v31 }
0x15dc   :  { %v3228_v38 = vmul.f32 1.442695, %v3226_v32 }
0x15dd   :  { %v3237_v0 = vpop.xlane.xlu0 %3236 }
0x15de   :  { %4775 = vpow2.f32 %v3228_v38 }
0x15df   :  { %4777 = vrcp.f32 %v3237_v0 }
0x15eb   :  { %v4776_v41 = vpop.eup %4775 }
0x15ec   :  { %v4778_v16 = vpop.eup %4777  ;;  %v3232_v17 = vsel %vm2355_vm3, %v4776_v41, 0.0 }
0x15ed   :  { %3233 = vadd.xlane.f32.xlu0 %v3232_v17  ;;  %v3241_v42 = vmul.f32 %v4778_v16, %v4774_v26 }
0x15ef   :  { %4625 = vmatmul.mubr.msk.f32.vlgmr.msra.gmra.mxu1 %vm2355_vm3, %v3241_v42 }
0x15f0   :  { %4633 = vmatpush3.xpose.msk.msra.mxu1 %vm257_vm2, %v3491_v40  ;;  %4636 = vmatprep.mubr.msk.f32.mxu1 %vm4929_vm1, %v4928_v34 }
0x15f1   :  { %4634 = vmatprep.subr.mxu1 %v4928_v34 }
0x15f4   :  { %4635 = vmatpush3.xpose.msk.msra.mxu1 %vm257_vm2, %v3489_v44 }
0x15f5   :  { %4646 = vmatprep.subr.mxu1 %v4928_v34 }
0x15f7   :  { %4637 = vmatmul.mubr.msk.f32.vlgmr.msra.gmra.mxu1 %vm257_vm2, %v3487_v45 }
0x15f8   :  { %4650 = vmatprep.mubr.msk.f32.mxu1 %vm4929_vm1, %v4928_v34 }
0x1603   :  { %3244 = vrot.lane.b32.xlu0 %v5270_v10, %s4936_s25 }
0x1607   :  { %3400 = vrot.lane.b32.xlu0 %v5233_v36, %s4935_s24 }
0x160b   :  { %3572 = vrot.lane.b32.xlu0 %v5277_v15, %s4940_s7 }
0x160f   :  { %3570 = vrot.lane.b32.xlu0 %v5279_v18, %s4940_s7 }
0x1613   :  { %3568 = vrot.lane.b32.xlu0 %v5291_v20, %s4940_s7 }
0x1676   :  { %v3234_v46 = vpop.xlane.xlu0 %3233 }
0x1677   :  { %4779 = vrcp.f32 %v3234_v46 }
0x167a   :  { %v3245_v47 = vpop.permute.xlu0 %3244 }
0x167b   :  { %4614 = vmatpush3.msra.mxu0 %v3245_v47 }
0x167c   :  { %4615 = vmatprep.subr.mxu0 %v4928_v34 }
0x167d   :  { %4616 = vmatpush3.msra.mxu0 %v3243_v62 }
0x167e   :  { %v3401_v48 = vpop.permute.xlu0 %3400 }
0x167f   :  { %4627 = vmatprep.subr.mxu0 %v3401_v48 }
0x1682   :  { %v3573_v53 = vpop.permute.xlu0 %3572 }
0x1684   :  { %v4780_v49 = vpop.eup %4779 }
0x1685   :  { %v3240_v36 = vmul.f32 %v4780_v49, %v4776_v41 }
0x1686   :  { %v3571_v56 = vpop.permute.xlu0 %3570 }
0x1687   :  { %4618 = vmatmul.mubr.msk.f32.vlgmr.msra.gmra.mxu0 %vm2355_vm3, %v3240_v36 }
0x1688   :  { %4628 = vmatpush3.msra.mxu0 %v3401_v48 }
0x1689   :  { %4639 = vmatprep.subr.mxu0 %v4928_v34 }
0x16af   :  { %v3396_v1 = vpop.f32.mrf.mxu1 }
0x16b1   :  { %v4626_v51 = vpop.f32.mrf.mxu1 }
0x16b7   :  { %v3564_v52 = vpop.f32.mrf.mxu1 }
0x16b8   :  { %v3650_v20 = vmul.f32 0.35355338, %v3564_v52 }
0x16b9   :  { %v4638_v14 = vpop.f32.mrf.mxu1 }
0x16ba   :  { %v3652_v35 = vadd.f32 %v5312_v27, %v3650_v20 }
0x16bc   :  { %v3654_v39 = vsel %vm2355_vm3, %v3652_v35, -inf }
0x16bd   :  { %3655 = vmax.xlane.f32.xlu1 %v3654_v39  ;;  %v110_v39 = vld [vmem:[#allocation8 + $0x58] sm:$0xff] }
0x16ce   :  { %3678 = vrot.lane.b32.xlu1 %v5270_v10, %s4939_s30  ;;  %v3569_v10 = vpop.permute.xlu0 %3568 }
0x16d2   :  { %3676 = vrot.lane.b32.xlu1 %v5272_v43, %s4939_s30 }
0x16d6   :  { %3755 = vrot.lane.b32.xlu1 %v5279_v18, %s4939_s30 }
0x16da   :  { %3834 = vrot.lane.b32.xlu1 %v5226_v33, %s4935_s24 }
0x1746   :  { %v3656_v54 = vpop.xlane.xlu1 %3655 }
0x1747   :  { %v3317_v55 = vpop.f32.mrf.mxu0  ;;  %v3660_v43 = vsub.f32 %v3652_v35, %v3656_v54  ;;  %v107_v54 = vld [vmem:[#allocation8 + $0x40] sm:$0xff] }
0x1748   :  { %4629 = vmatprep.mubr.msk.f32.mxu0 %vm257_vm2, %v3317_v55  ;;  %v118_v55 = vld [vmem:[#allocation8 + $0x98] sm:$0xff] }
0x1749   :  { %v4619_v27 = vpop.f32.mrf.mxu0  ;;  %4630 = vmatmul.mubr.msk.f32.vlgmr.msra.gmra.mxu0 %vm257_vm2, %v3396_v1  ;;  %v3662_v18 = vmul.f32 1.442695, %v3660_v43 }
0x174a   :  { %v3679_v57 = vpop.permute.xlu1 %3678  ;;  %4640 = vmatpush3.xpose.msk.msra.mxu0 %vm257_vm2, %v3573_v53  ;;  %4643 = vmatprep.mubr.msk.f32.mxu0 %vm4929_vm1, %v4928_v34  ;;  %v108_v53 = vld [vmem:[#allocation8 + $0x48] sm:$0xff]  ;;  %v117_v27 = vld [vmem:[#allocation8 + $0x90] sm:$0xff] }
0x174b   :  { %4647 = vmatpush3.msra.mxu1 %v3679_v57  ;;  %4641 = vmatprep.subr.mxu0 %v4928_v34  ;;  %4781 = vpow2.f32 %v3662_v18  ;;  %v115_v57 = vld [vmem:[#allocation8 + $0x80] sm:$0xff] }
0x174c   :  { %4648 = vmatprep.subr.mxu1 %v4928_v34 }
0x174e   :  { %v3677_v33 = vpop.permute.xlu1 %3676  ;;  %4642 = vmatpush3.xpose.msk.msra.mxu0 %vm257_vm2, %v3571_v56  ;;  %v116_v56 = vld [vmem:[#allocation8 + $0x88] sm:$0xff] }
0x174f   :  { %4649 = vmatpush3.msra.mxu1 %v3677_v33  ;;  %4653 = vmatprep.subr.mxu0 %v4928_v34 }
0x1751   :  { %4644 = vmatmul.mubr.msk.f32.vlgmr.msra.gmra.mxu0 %vm257_vm2, %v3569_v10 }
0x1752   :  { %4657 = vmatprep.mubr.msk.f32.mxu0 %vm4929_vm1, %v4928_v34 }
0x1758   :  { %v4782_v9 = vpop.eup %4781 }
0x1759   :  { %v3666_v11 = vsel %vm2355_vm3, %v4782_v9, 0.0 }
0x1809   :  { %v4631_v61 = vpop.f32.mrf.mxu0 }
0x180a   :  { %v3485_v3 = vadd.f32 %v4631_v61, %v3049_v59 }
0x180b   :  { %v3475_v4 = vpop.f32.mrf.mxu0 }
0x180c   :  { %v3484_v5 = vadd.f32 %v3475_v4, %v3044_v2 }
0x1811   :  { %v3646_v60 = vpop.f32.mrf.mxu0 }
0x1812   :  { %v3651_v6 = vmul.f32 0.35355338, %v3646_v60 }
0x1813   :  { %v4645_v7 = vpop.f32.mrf.mxu0 }
0x1814   :  { %v3653_v8 = vadd.f32 %v5307_v23, %v3651_v6  ;;  %v3756_v23 = vpop.permute.xlu1 %3755 }
0x1816   :  { %v3657_v62 = vsel %vm2355_vm3, %v3653_v8, -inf }
0x1817   :  { %3658 = vmax.xlane.f32.xlu0 %v3657_v62 }
0x1818   :  { %v3835_v24 = vpop.permute.xlu1 %3834 }
0x1819   :  { %4660 = vmatprep.subr.mxu1 %v3835_v24 }
0x181b   :  { %3667 = vadd.xlane.f32.xlu0 %v3666_v11  ;;  %v114_v11 = vld [vmem:[#allocation8 + $0x78] sm:$0xff] }
0x18a0   :  { %v3659_v58 = vpop.xlane.xlu0 %3658 }
0x18a1   :  { %v3661_v12 = vsub.f32 %v3653_v8, %v3659_v58  ;;  %v113_v58 = vld [vmem:[#allocation8 + $0x70] sm:$0xff] }
0x18a3   :  { %v3664_v13 = vmul.f32 1.442695, %v3661_v12  ;;  %v112_v12 = vld [vmem:[#allocation8 + $0x68] sm:$0xff] }
0x18a4   :  { %v3668_v63 = vpop.xlane.xlu0 %3667 }
0x18a5   :  { %4783 = vpow2.f32 %v3664_v13  ;;  %v111_v13 = vld [vmem:[#allocation8 + $0x60] sm:$0xff] }
0x18a6   :  { %4785 = vrcp.f32 %v3668_v63  ;;  %v4251_v63 = vld [vmem:[#allocation10 + $0x2] ss:$0 sm:$0xff] }
0x18b2   :  { %v4784_v19 = vpop.eup %4783 }
0x18b3   :  { %v4786_v21 = vpop.eup %4785  ;;  %v3669_v37 = vsel %vm2355_vm3, %v4784_v19, 0.0 }
0x18b4   :  { %3670 = vadd.xlane.f32.xlu0 %v3669_v37  ;;  %v3674_v22 = vmul.f32 %v4786_v21, %v4782_v9 }
0x18b6   :  { %4651 = vmatmul.mubr.msk.f32.vlgmr.msra.gmra.mxu1 %vm2355_vm3, %v3674_v22 }
0x18b7   :  { %4661 = vmatpush3.msra.mxu1 %v3835_v24 }
0x18b8   :  { %4676 = vmatprep.subr.mxu1 %v118_v55 }
0x18ca   :  { %3757 = vrot.lane.b32.xlu0 %v5277_v15, %s4939_s30 }
0x18ce   :  { %3920 = vrot.lane.b32.xlu0 %v5256_v50, %s4935_s24 }
0x193d   :  { %v3671_v25 = vpop.xlane.xlu0 %3670 }
0x193e   :  { %4787 = vrcp.f32 %v3671_v25  ;;  %v4254_v25 = vld [vmem:[#allocation10 + $0x3] ss:$0 sm:$0xff] }
0x1941   :  { %v3758_v26 = vpop.permute.xlu0 %3757 }
0x1942   :  { %4654 = vmatpush3.msra.mxu0 %v3758_v26 }
0x1943   :  { %4655 = vmatprep.subr.mxu0 %v4928_v34 }
0x1944   :  { %4656 = vmatpush3.msra.mxu0 %v3756_v23 }
0x1945   :  { %v3921_v40 = vpop.permute.xlu0 %3920  ;;  %4665 = vmatprep.subr.mxu0 %v110_v39 }
0x194b   :  { %v4788_v29 = vpop.eup %4787 }
0x194c   :  { %v3675_v31 = vmul.f32 %v4788_v29, %v4784_v19 }
0x194e   :  { %4658 = vmatmul.mubr.msk.f32.vlgmr.msra.gmra.mxu0 %vm2355_vm3, %v3675_v31 }
0x194f   :  { %4666 = vmatpush3.msra.mxu0 %v110_v39 }
0x1976   :  { %v3751_v32 = vpop.f32.mrf.mxu1 }
0x1977   :  { %4662 = vmatprep.mubr.msk.f32.mxu1 %vm257_vm2, %v3751_v32 }
0x1978   :  { %v4652_v15 = vpop.f32.mrf.mxu1 }
0x1a0e   :  { %v3830_v50 = vpop.f32.mrf.mxu0 }
0x1a0f   :  { %4663 = vmatmul.mubr.msk.f32.vlgmr.msra.gmra.mxu1 %vm257_vm2, %v3830_v50 }
0x1a10   :  { %v4659_v38 = vpop.f32.mrf.mxu0  ;;  %4677 = vmatpush3.msra.mxu1 %v118_v55 }
0x1a11   :  { %4678 = vmatprep.subr.mxu1 %v117_v27 }
0x1a12   :  { %4679 = vmatpush3.msra.mxu1 %v117_v27 }
0x1a13   :  { %4680 = vmatprep.subr.mxu1 %v116_v56 }
0x1a14   :  { %4681 = vmatpush3.msra.mxu1 %v116_v56 }
0x1a15   :  { %4682 = vmatprep.subr.mxu1 %v115_v57 }
0x1a16   :  { %4683 = vmatpush3.msra.mxu1 %v115_v57 }
0x1a17   :  { %4684 = vmatprep.subr.mxu1 %v114_v11 }
0x1a18   :  { %4685 = vmatpush3.msra.mxu1 %v114_v11 }
0x1a19   :  { %4686 = vmatprep.subr.mxu1 %v113_v58 }
0x1a1a   :  { %4687 = vmatpush3.msra.mxu1 %v113_v58 }
0x1a1b   :  { %4688 = vmatprep.subr.mxu1 %v112_v12 }
0x1a1c   :  { %4689 = vmatpush3.msra.mxu1 %v112_v12 }
0x1a1d   :  { %4690 = vmatprep.subr.mxu1 %v111_v13 }
0x1a1e   :  { %4691 = vmatpush3.msra.mxu1 %v111_v13 }
0x1acf   :  { %v4664_v0 = vpop.f32.mrf.mxu1 }
0x1ad0   :  { %v3919_v41 = vadd.f32 %v4664_v0, %v3485_v3  ;;  %v4249_v3 = vld [vmem:[#allocation10 + $0x8] ss:$0 sm:$0xff] }
0x1ad1   :  { %v3909_v16 = vpop.f32.mrf.mxu1 }
0x1ad2   :  { %v5518_v17 = vadd.f32 %v3921_v40, %v3919_v41  ;;  %v3918_v34 = vadd.f32 %v3909_v16, %v3484_v5  ;;  %v4250_v5 = vld [vmem:[#allocation10 + $0x9] ss:$0 sm:$0xff] }
0x1ad4   :  { %v5520_v42 = vadd.f32 %v3921_v40, %v3918_v34  ;;  %v3926_v44 = vadd.f32 %v5518_v17, %v5217_v28 }
0x1ad6   :  { %v3930_v45 = vsel %vm129_vm0, %v3926_v44, 0.0  ;;  %v3925_v46 = vadd.f32 %v5520_v42, %v5220_v30  ;;  %v109_v30 = vld [vmem:[#allocation8 + $0x50] sm:$0xff] }
0x1ad7   :  { %3931 = vadd.xlane.f32.xlu0 %v3930_v45  ;;  %4667 = vmatprep.subr.mxu0 %v109_v30 }
0x1ad8   :  { %v3927_v47 = vsel %vm129_vm0, %v3925_v46, 0.0  ;;  %4668 = vmatpush3.msra.mxu0 %v109_v30 }
0x1ad9   :  { %3928 = vadd.xlane.f32.xlu1 %v3927_v47  ;;  %4669 = vmatprep.subr.mxu0 %v108_v53 }
0x1ada   :  { %4670 = vmatpush3.msra.mxu0 %v108_v53 }
0x1adb   :  { %4671 = vmatprep.subr.mxu0 %v107_v54 }
0x1adc   :  { %4672 = vmatpush3.msra.mxu0 %v107_v54 }
0x1b60   :  { %v3932_v48 = vpop.xlane.xlu0 %3931 }
0x1b61   :  { %v3934_v49 = vmul.f32 0.03125, %v3932_v48 }
0x1b62   :  { %v3929_v36 = vpop.xlane.xlu1 %3928 }
0x1b63   :  { %v3933_v1 = vmul.f32 0.03125, %v3929_v36  ;;  %v3936_v51 = vsub.f32 %v3926_v44, %v3934_v49 }
0x1b65   :  { %v3935_v52 = vsub.f32 %v3925_v46, %v3933_v1  ;;  %v3938_v35 = vmul.f32 %v3936_v51, %v3936_v51 }
0x1b67   :  { %v3937_v20 = vmul.f32 %v3935_v52, %v3935_v52  ;;  %v3942_v28 = vsel %vm129_vm0, %v3938_v35, 0.0 }
0x1b69   :  { %v3939_v14 = vsel %vm129_vm0, %v3937_v20, 0.0 }
0x1b6a   :  { %3940 = vadd.xlane.f32.xlu0 %v3939_v14 }
0x1b6e   :  { %3943 = vadd.xlane.f32.xlu0 %v3942_v28 }
0x1bf3   :  { %v3941_v33 = vpop.xlane.xlu0 %3940 }
0x1bf4   :  { %v3945_v10 = vmul.f32 0.03125, %v3941_v33 }
0x1bf6   :  { %v3947_v43 = vadd.f32 1e-05, %v3945_v10 }
0x1bf7   :  { %v3944_v18 = vpop.xlane.xlu0 %3943 }
0x1bf8   :  { %4789 = vrsqrt.f32 %v3947_v43  ;;  %v3946_v59 = vmul.f32 0.03125, %v3944_v18 }
0x1bfa   :  { %v3948_v61 = vadd.f32 1e-05, %v3946_v59 }
0x1bfc   :  { %4791 = vrsqrt.f32 %v3948_v61 }
0x1c05   :  { %v4790_v2 = vpop.eup %4789 }
0x1c06   :  { %v3951_v4 = vmul.f32 %v4790_v2, %v3935_v52 }
0x1c08   :  { %v3957_v60 = vmul.f32 %v4249_v3, %v3951_v4 }
0x1c09   :  { %v4792_v6 = vpop.eup %4791 }
0x1c0a   :  { %v3952_v7 = vmul.f32 %v4792_v6, %v3936_v51  ;;  %v3963_v8 = vadd.f32 %v4250_v5, %v3957_v60 }
0x1c0c   :  { %v3958_v62 = vmul.f32 %v4249_v3, %v3952_v7  ;;  %4673 = vmatprep.mubr.msk.f32.mxu0 %vm129_vm0, %v3963_v8 }
0x1c0e   :  { %v3964_v9 = vadd.f32 %v4250_v5, %v3958_v62 }
0x1c10   :  { %4674 = vmatmul.mubr.msk.f32.vlgmr.msra.gmra.mxu0 %vm129_vm0, %v3964_v9 }
0x1cd0   :  { %v4675_v19 = vpop.f32.mrf.mxu0 }
0x1cd1   :  { %v4047_v21 = vadd.f32 %v4675_v19, %v4251_v63 }
0x1cd2   :  { %v4041_v37 = vpop.f32.mrf.mxu0 }
0x1cd3   :  { %v4042_v22 = vadd.f32 %v4251_v63, %v4041_v37  ;;  %v4051_v24 = vmax.f32 %v4047_v21, 0.0 }
0x1cd5   :  { %v4050_v23 = vmax.f32 %v4042_v22, 0.0 }
0x1cd7   :  { %4692 = vmatprep.mubr.msk.f32.mxu1 %vm4056_vm4, %v4050_v23 }
0x1cd8   :  { %4693 = vmatmul.mubr.msk.f32.vlgmr.msra.gmra.mxu1 %vm4056_vm4, %v4051_v24 }
0x1d98   :  { %v4694_v26 = vpop.f32.mrf.mxu1 }
0x1d99   :  { %v4135_v29 = vadd.f32 %v4694_v26, %v4254_v25 }
0x1d9a   :  { %v4129_v31 = vpop.f32.mrf.mxu1 }
0x1d9b   :  { %v4139_v32 = vadd.f32 %v4135_v29, %v5518_v17  ;;  %v4130_v15 = vadd.f32 %v4254_v25, %v4129_v31 }
0x1d9d   :  { %4141 = vst.msk [vmem:[#allocation11 + $0x8] sm:$0xff] %vm129_vm0, %v4139_v32  ;;  %v4138_v50 = vadd.f32 %v4130_v15, %v5520_v42 }
0x1d9f   :  { %4140 = vst.msk [vmem:[#allocation11] sm:$0xff] %vm129_vm0, %v4138_v50 }
0x1da0   :  { %4904 = shalt.err (!%p4901_p1)
}
0x1da1   :  { %4153 = dma.vmem_to_hbm [thread:$0]  %s4148_s1, 256, %s5548_s6, [#allocation4], %s4923_s26, %s4923_s26, %s4924_s27  }
0x1da2   :  { %4919 = dma.done.wait [#allocation4], 256  }
0x1da3   :  { %4920 = vsyncadd [#allocation4], 4294967040 }
0x1da4   :  { %4157 = vsyncpa [#allocation3], 1 }
0x1da5   :  { %4158 = vsyncpa [#allocation6], 1 }
0x1da6   :  { %4159 = vsyncpa [#allocation9], 1 }
0x1da7   :  { %4160 = vsyncpa [#allocation4], 1 }

</bundles_post_ra>
